<compile_context>
chip_gen: v7x
topology: tpu7x:2x2x1
jax: 0.10.0
libtpu: 0.0.40
codegen_flags: <defaults>
</compile_context>

<pallas_src>
import jax
import jax.numpy as jnp
from jax import lax
from jax.experimental import pallas as pl
from jax.experimental.pallas import tpu as pltpu


# ----------------------------- Pallas kernels -----------------------------

def _conv_pool_kernel(pa_ref, pb_ref, pc_ref, pd_ref, w_ref, b_ref, o_ref):
    """Fused conv (matmul over transposed im2col patches) + bias + ReLU + 2x2 max-pool.

    pa..pd : [1, K, S]  patch matrices, one per pool phase (di, dj)
    w      : [Cout, K]  flattened conv weight
    b      : [Cout, 1]
    o      : [1, Cout, S]  with S = pooled_H * pooled_W   (lane-dense output)
    """
    f32 = jnp.float32
    w = w_ref[...]
    ya = jnp.dot(w, pa_ref[0], preferred_element_type=f32)
    yb = jnp.dot(w, pb_ref[0], preferred_element_type=f32)
    yc = jnp.dot(w, pc_ref[0], preferred_element_type=f32)
    yd = jnp.dot(w, pd_ref[0], preferred_element_type=f32)
    y = jnp.maximum(jnp.maximum(ya, yb), jnp.maximum(yc, yd))    # 2x2 max-pool
    o_ref[0] = jnp.maximum(y + b_ref[...], 0.0)                  # bias + ReLU


def _head_kernel(p2a_ref, p2b_ref, p2c_ref, p2d_ref, aud_ref,
                 w2_ref, b2_ref,
                 wfc1_ref, bfc1_ref, wfc2_ref, bfc2_ref, wfc3_ref, bfc3_ref,
                 w1s_ref, b1s_ref, w2s_ref, b2s_ref, w3s_ref, b3s_ref,
                 wfc_ref, bfc_ref, o_ref):
    """Per-sample fused tail: conv2+ReLU+pool, fc1..fc3 (image), fc1s..fc3s (audio),
    and the final 18->9 fc.  torch.cat is folded into two matmuls against row
    slices of fc.weight^T, so no in-kernel concat is needed."""
    f32 = jnp.float32

    # ---- conv2 + bias + ReLU + pool (same pool-fused matmul trick) ----
    w2 = w2_ref[...]                                             # [16, 150]
    ya = jnp.dot(w2, p2a_ref[0], preferred_element_type=f32)
    yb = jnp.dot(w2, p2b_ref[0], preferred_element_type=f32)
    yc = jnp.dot(w2, p2c_ref[0], preferred_element_type=f32)
    yd = jnp.dot(w2, p2d_ref[0], preferred_element_type=f32)
    y = jnp.maximum(jnp.maximum(ya, yb), jnp.maximum(yc, yd))
    pooled2 = jnp.maximum(y + b2_ref[...], 0.0)                  # [16, 25] = (co, i*5+j)

    # ---- fc1 consumes PyTorch's (c, h, w) flatten order directly ----
    # x.view(-1, 400)[k] with k = co*25 + s  ->  accumulate one [1,25]x[25,120]
    # matmul per conv2 output channel (no reshape/transpose needed in-kernel).
    acc = jnp.zeros((1, 120), f32)
    for co in range(16):
        acc = acc + jnp.dot(pooled2[co:co + 1, :],
                            wfc1_ref[co * 25:(co + 1) * 25, :],
                            preferred_element_type=f32)
    x = jnp.maximum(acc + bfc1_ref[...], 0.0)                                     # [1, 120]
    x = jnp.maximum(jnp.dot(x, wfc2_ref[...], preferred_element_type=f32)
                    + bfc2_ref[...], 0.0)                                         # [1, 84]
    img = jnp.dot(x, wfc3_ref[...], preferred_element_type=f32) + bfc3_ref[...]   # [1, 9]

    # ---- audio branch ----
    a = aud_ref[0]                                                                # [1, 10]
    a = jnp.maximum(jnp.dot(a, w1s_ref[...], preferred_element_type=f32)
                    + b1s_ref[...], 0.0)                                          # [1, 128]
    a = jnp.maximum(jnp.dot(a, w2s_ref[...], preferred_element_type=f32)
                    + b2s_ref[...], 0.0)                                          # [1, 256]
    a = jnp.dot(a, w3s_ref[...], preferred_element_type=f32) + b3s_ref[...]       # [1, 9]

    # ---- late fusion: cat([audio, image]) @ fc.W^T + b ----
    out = (jnp.dot(a, wfc_ref[0:9, :], preferred_element_type=f32)
           + jnp.dot(img, wfc_ref[9:18, :], preferred_element_type=f32)
           + bfc_ref[...])
    o_ref[0] = out                                                                # [1, 9]


# ----------------------------- wrappers -----------------------------------

def _pooled_conv_patch_mats(x, kh, kw):
    """Layout plumbing (no FLOPs): build the 4 pool-phase transposed im2col
    matrices for a valid stride-1 conv followed by 2x2 max-pool.

    x: [B, C, H, W]  ->  4 arrays of shape [B, C*kh*kw, Hp*Wp] where
      mat[di*2+dj][b, c*kh*kw + ki*kw + kj, i*Wp + j] = x[b, c, 2i+di+ki, 2j+dj+kj]
    """
    B, C, H, W = x.shape
    Ho, Wo = H - kh + 1, W - kw + 1
    Hp, Wp = Ho // 2, Wo // 2
    mats = []
    for di in range(2):
        for dj in range(2):
            slabs = []
            for ki in range(kh):
                for kj in range(kw):
                    s = x[:, :, di + ki::2, dj + kj::2][:, :, :Hp, :Wp]  # [B,C,Hp,Wp]
                    slabs.append(s)
            p = jnp.stack(slabs, axis=2)                 # [B, C, kh*kw, Hp, Wp]
            p = p.reshape(B, C * kh * kw, Hp * Wp)       # rows ordered (c, ki, kj)
            mats.append(p)
    return mats, Hp, Wp


def conv_pool_stage(patch_mats, w2d, b2d):
    """One fused conv+bias+ReLU+pool pallas_call.  Returns [B, Cout, Hp*Wp]."""
    B, K, S = patch_mats[0].shape
    Cout = w2d.shape[0]
    in_specs = ([pl.BlockSpec((1, K, S), lambda b: (b, 0, 0))] * 4
                + [pl.BlockSpec((Cout, K), lambda b: (0, 0)),
                   pl.BlockSpec((Cout, 1), lambda b: (0, 0))])
    return pl.pallas_call(
        _conv_pool_kernel,
        out_shape=jax.ShapeDtypeStruct((B, Cout, S), jnp.float32),
        grid=(B,),
        in_specs=in_specs,
        out_specs=pl.BlockSpec((1, Cout, S), lambda b: (b, 0, 0)),
        compiler_params=pltpu.CompilerParams(dimension_semantics=("parallel",)),
    )(*patch_mats, w2d, b2d)


def head_stage(p2_mats, audio3, q):
    """Fused conv2-stage + both FC heads + late-fusion fc.  Returns [B, 1, 9]."""
    B, K2, S2 = p2_mats[0].shape
    A = audio3.shape[2]
    weights = [q["w2m"], q["b2m"],
               q["fc1_wt"], q["fc1_b2"], q["fc2_wt"], q["fc2_b2"],
               q["fc3_wt"], q["fc3_b2"],
               q["fc1s_wt"], q["fc1s_b2"], q["fc2s_wt"], q["fc2s_b2"],
               q["fc3s_wt"], q["fc3s_b2"],
               q["fc_wt"], q["fc_b2"]]
    in_specs = ([pl.BlockSpec((1, K2, S2), lambda b: (b, 0, 0))] * 4
                + [pl.BlockSpec((1, 1, A), lambda b: (b, 0, 0))]
                + [pl.BlockSpec(w.shape, lambda b: (0, 0)) for w in weights])
    return pl.pallas_call(
        _head_kernel,
        out_shape=jax.ShapeDtypeStruct((B, 1, 9), jnp.float32),
        grid=(B,),
        in_specs=in_specs,
        out_specs=pl.BlockSpec((1, 1, 9), lambda b: (b, 0, 0)),
        compiler_params=pltpu.CompilerParams(dimension_semantics=("parallel",)),
    )(*p2_mats, audio3, *weights)


# ----------------------------- the Net forward -----------------------------

def net_forward(q, audio_data, image):
    B = image.shape[0]
    # conv1 + ReLU + pool  (one fused kernel; pool phases pre-sliced in glue)
    p1, hp1, wp1 = _pooled_conv_patch_mats(image, 5, 5)           # 4 x [B, 75, 196]
    pooled1 = conv_pool_stage(p1, q["w1m"], q["b1m"])             # [B, 6, 196]
    pooled1 = pooled1.reshape(B, 6, hp1, wp1)                     # [B, 6, 14, 14]
    # conv2 + pool + full FC / fusion head  (one fused kernel)
    p2, _, _ = _pooled_conv_patch_mats(pooled1, 5, 5)             # 4 x [B, 150, 25]
    audio3 = audio_data.reshape(B, 1, audio_data.shape[1])
    out = head_stage(p2, audio3, q)                               # [B, 1, 9]
    return out.reshape(B, 9)


# ----------------------------- params -----------------------------

def _uniform(key, shape, fan_in):
    bound = 1.0 / jnp.sqrt(jnp.float32(fan_in))
    return jax.random.uniform(key, shape, jnp.float32, -bound, bound)


def init_params(key):
    """PyTorch-layout parameters (conv: [Cout,Cin,kh,kw], fc: [out,in])."""
    ks = jax.random.split(key, 20)
    p = {}
    p["conv1_w"] = _uniform(ks[0], (6, 3, 5, 5), 3 * 5 * 5)
    p["conv1_b"] = _uniform(ks[1], (6,), 3 * 5 * 5)
    p["conv2_w"] = _uniform(ks[2], (16, 6, 5, 5), 6 * 5 * 5)
    p["conv2_b"] = _uniform(ks[3], (16,), 6 * 5 * 5)
    p["fc1_w"] = _uniform(ks[4], (120, 400), 400)
    p["fc1_b"] = _uniform(ks[5], (120,), 400)
    p["fc2_w"] = _uniform(ks[6], (84, 120), 120)
    p["fc2_b"] = _uniform(ks[7], (84,), 120)
    p["fc3_w"] = _uniform(ks[8], (9, 84), 84)
    p["fc3_b"] = _uniform(ks[9], (9,), 84)
    p["fc1s_w"] = _uniform(ks[10], (128, 10), 10)
    p["fc1s_b"] = _uniform(ks[11], (128,), 10)
    p["fc2s_w"] = _uniform(ks[12], (256, 128), 128)
    p["fc2s_b"] = _uniform(ks[13], (256,), 128)
    p["fc3s_w"] = _uniform(ks[14], (9, 256), 256)
    p["fc3s_b"] = _uniform(ks[15], (9,), 256)
    p["fc_w"] = _uniform(ks[16], (9, 18), 18)
    p["fc_b"] = _uniform(ks[17], (9,), 18)
    return p


def prepare_params(p):
    """One-time weight re-layout for the kernels (no per-call transposes)."""
    q = {}
    q["w1m"] = p["conv1_w"].reshape(6, 3 * 5 * 5)        # [6, 75]
    q["b1m"] = p["conv1_b"].reshape(6, 1)
    q["w2m"] = p["conv2_w"].reshape(16, 6 * 5 * 5)       # [16, 150]
    q["b2m"] = p["conv2_b"].reshape(16, 1)
    for name in ("fc1", "fc2", "fc3", "fc1s", "fc2s", "fc3s", "fc"):
        q[name + "_wt"] = jnp.transpose(p[name + "_w"])  # [in, out]
        q[name + "_b2"] = p[name + "_b"].reshape(1, -1)
    return q


# ----------------------------- pure-JAX reference -----------------------------

def reference_forward(p, audio, image):
    prec = lax.Precision.HIGHEST

    def conv(x, w, b):
        y = lax.conv_general_dilated(x, w, window_strides=(1, 1), padding="VALID",
                                     dimension_numbers=("NCHW", "OIHW", "NCHW"),
                                     precision=prec)
        return y + b[None, :, None, None]

    def pool(x):
        return lax.reduce_window(x, -jnp.inf, lax.max, (1, 1, 2, 2), (1, 1, 2, 2), "VALID")

    def linear(x, w, b):
        return jnp.dot(x, w.T, precision=prec) + b

    x = pool(jax.nn.relu(conv(image, p["conv1_w"], p["conv1_b"])))
    x = pool(jax.nn.relu(conv(x, p["conv2_w"], p["conv2_b"])))
    B = x.shape[0]
    x = x.reshape(B, 16 * 5 * 5)
    x = jax.nn.relu(linear(x, p["fc1_w"], p["fc1_b"]))
    x = jax.nn.relu(linear(x, p["fc2_w"], p["fc2_b"]))
    x = linear(x, p["fc3_w"], p["fc3_b"])
    a = jax.nn.relu(linear(audio, p["fc1s_w"], p["fc1s_b"]))
    a = jax.nn.relu(linear(a, p["fc2s_w"], p["fc2s_b"]))
    a = linear(a, p["fc3s_w"], p["fc3s_b"])
    comb = jnp.concatenate([a, x], axis=1)
    return linear(comb, p["fc_w"], p["fc_b"])


# ----------------------------- main -----------------------------

if __name__ == "__main__":
    key = jax.random.PRNGKey(0)
    k_param, k_img, k_aud = jax.random.split(key, 3)

    params = init_params(k_param)
    q = prepare_params(params)

    B = 2
    image = jax.random.normal(k_img, (B, 3, 32, 32), jnp.float32)   # NCHW
    audio = jax.random.normal(k_aud, (B, 10), jnp.float32)

    fwd = jax.jit(net_forward)
    out = fwd(q, audio, image)
    out = jax.block_until_ready(out)

    assert out.shape == (B, 9), out.shape
    assert bool(jnp.all(jnp.isfinite(out)))

    ref = reference_forward(params, audio, image)
    max_err = float(jnp.max(jnp.abs(out - ref)))
    assert max_err < 2e-3, f"mismatch vs reference: max abs err = {max_err}"

    print("KERNEL_OK")
</pallas_src>

<mosaic_0001>
module attributes {stable_mosaic.version = 11 : i64} {
  func.func @_conv_pool_kernel(%arg0: i32, %arg1: memref<1x75x196xf32, #tpu.memory_space<vmem>>, %arg2: memref<1x75x196xf32, #tpu.memory_space<vmem>>, %arg3: memref<1x75x196xf32, #tpu.memory_space<vmem>>, %arg4: memref<1x75x196xf32, #tpu.memory_space<vmem>>, %arg5: memref<6x75xf32, #tpu.memory_space<vmem>>, %arg6: memref<6x1xf32, #tpu.memory_space<vmem>>, %arg7: memref<1x6x196xf32, #tpu.memory_space<vmem>>) attributes {dimension_semantics = [#tpu.dimension_semantics<parallel>], iteration_bounds = array<i64: 2>, scalar_prefetch = 0 : i64, scratch_operands = 0 : i64, tpu.core_type = #tpu.core_type<tc>, window_params = [{transform_indices = @transform_0, window_bounds = array<i64: 1, 75, 196>}, {transform_indices = @transform_1, window_bounds = array<i64: 1, 75, 196>}, {transform_indices = @transform_2, window_bounds = array<i64: 1, 75, 196>}, {transform_indices = @transform_3, window_bounds = array<i64: 1, 75, 196>}, {pipeline_mode = #tpu.pipeline_mode<synchronous>, transform_indices = @transform_4, window_bounds = array<i64: 6, 75>}, {pipeline_mode = #tpu.pipeline_mode<synchronous>, transform_indices = @transform_5, window_bounds = array<i64: 6, 1>}, {transform_indices = @transform_6, window_bounds = array<i64: 1, 6, 196>}]} {
    %c0 = arith.constant 0 : index
    %c0_0 = arith.constant 0 : index
    %0 = vector.load %arg5[%c0, %c0_0] : memref<6x75xf32, #tpu.memory_space<vmem>>, vector<6x75xf32>
    %c0_1 = arith.constant 0 : index
    %c0_2 = arith.constant 0 : index
    %c0_3 = arith.constant 0 : index
    %1 = vector.load %arg1[%c0_1, %c0_2, %c0_3] : memref<1x75x196xf32, #tpu.memory_space<vmem>>, vector<1x75x196xf32>
    %2 = vector.shape_cast %1 : vector<1x75x196xf32> to vector<75x196xf32>
    %cst = arith.constant dense<0.000000e+00> : vector<6x196xf32>
    %3 = tpu.matmul %0, %2, %cst {dimension_numbers = #tpu.dot_dimension_numbers<[1], [0], [0], [1], [0, 0, 1, 1], [], []>} : vector<6x75xf32>, vector<75x196xf32>, vector<6x196xf32> -> vector<6x196xf32>
    %c0_4 = arith.constant 0 : index
    %c0_5 = arith.constant 0 : index
    %c0_6 = arith.constant 0 : index
    %4 = vector.load %arg2[%c0_4, %c0_5, %c0_6] : memref<1x75x196xf32, #tpu.memory_space<vmem>>, vector<1x75x196xf32>
    %5 = vector.shape_cast %4 : vector<1x75x196xf32> to vector<75x196xf32>
    %cst_7 = arith.constant dense<0.000000e+00> : vector<6x196xf32>
    %6 = tpu.matmul %0, %5, %cst_7 {dimension_numbers = #tpu.dot_dimension_numbers<[1], [0], [0], [1], [0, 0, 1, 1], [], []>} : vector<6x75xf32>, vector<75x196xf32>, vector<6x196xf32> -> vector<6x196xf32>
    %c0_8 = arith.constant 0 : index
    %c0_9 = arith.constant 0 : index
    %c0_10 = arith.constant 0 : index
    %7 = vector.load %arg3[%c0_8, %c0_9, %c0_10] : memref<1x75x196xf32, #tpu.memory_space<vmem>>, vector<1x75x196xf32>
    %8 = vector.shape_cast %7 : vector<1x75x196xf32> to vector<75x196xf32>
    %cst_11 = arith.constant dense<0.000000e+00> : vector<6x196xf32>
    %9 = tpu.matmul %0, %8, %cst_11 {dimension_numbers = #tpu.dot_dimension_numbers<[1], [0], [0], [1], [0, 0, 1, 1], [], []>} : vector<6x75xf32>, vector<75x196xf32>, vector<6x196xf32> -> vector<6x196xf32>
    %c0_12 = arith.constant 0 : index
    %c0_13 = arith.constant 0 : index
    %c0_14 = arith.constant 0 : index
    %10 = vector.load %arg4[%c0_12, %c0_13, %c0_14] : memref<1x75x196xf32, #tpu.memory_space<vmem>>, vector<1x75x196xf32>
    %11 = vector.shape_cast %10 : vector<1x75x196xf32> to vector<75x196xf32>
    %cst_15 = arith.constant dense<0.000000e+00> : vector<6x196xf32>
    %12 = tpu.matmul %0, %11, %cst_15 {dimension_numbers = #tpu.dot_dimension_numbers<[1], [0], [0], [1], [0, 0, 1, 1], [], []>} : vector<6x75xf32>, vector<75x196xf32>, vector<6x196xf32> -> vector<6x196xf32>
    %13 = arith.maximumf %3, %6 : vector<6x196xf32>
    %14 = arith.maximumf %9, %12 : vector<6x196xf32>
    %15 = arith.maximumf %13, %14 : vector<6x196xf32>
    %c0_16 = arith.constant 0 : index
    %c0_17 = arith.constant 0 : index
    %16 = vector.load %arg6[%c0_16, %c0_17] : memref<6x1xf32, #tpu.memory_space<vmem>>, vector<6x1xf32>
    %17 = vector.broadcast %16 : vector<6x1xf32> to vector<6x196xf32>
    %18 = arith.addf %15, %17 : vector<6x196xf32>
    %cst_18 = arith.constant 0.000000e+00 : f32
    %19 = vector.broadcast %cst_18 : f32 to vector<6x196xf32>
    %20 = arith.maximumf %18, %19 : vector<6x196xf32>
    %c0_19 = arith.constant 0 : index
    %c0_20 = arith.constant 0 : index
    %c0_21 = arith.constant 0 : index
    %21 = vector.load %arg7[%c0_19, %c0_20, %c0_21] : memref<1x6x196xf32, #tpu.memory_space<vmem>>, vector<1x6x196xf32>
    %22 = vector.shape_cast %21 : vector<1x6x196xf32> to vector<6x196xf32>
    %23 = vector.shape_cast %20 : vector<6x196xf32> to vector<1x6x196xf32>
    tpu.vector_store %arg7[%c0_19, %c0_20, %c0_21], %23 {strides = array<i32>} : memref<1x6x196xf32, #tpu.memory_space<vmem>>, vector<1x6x196xf32>,
    return
  }
  func.func @transform_0(%arg0: i32) -> (i32, i32, i32) {
    %c0_i32 = arith.constant 0 : i32
    %c0_i32_0 = arith.constant 0 : i32
    %c0_i32_1 = arith.constant 0 : i32
    return %arg0, %c0_i32, %c0_i32_0 : i32, i32, i32
  }
  func.func @transform_1(%arg0: i32) -> (i32, i32, i32) {
    %c0_i32 = arith.constant 0 : i32
    %c0_i32_0 = arith.constant 0 : i32
    %c0_i32_1 = arith.constant 0 : i32
    return %arg0, %c0_i32, %c0_i32_0 : i32, i32, i32
  }
  func.func @transform_2(%arg0: i32) -> (i32, i32, i32) {
    %c0_i32 = arith.constant 0 : i32
    %c0_i32_0 = arith.constant 0 : i32
    %c0_i32_1 = arith.constant 0 : i32
    return %arg0, %c0_i32, %c0_i32_0 : i32, i32, i32
  }
  func.func @transform_3(%arg0: i32) -> (i32, i32, i32) {
    %c0_i32 = arith.constant 0 : i32
    %c0_i32_0 = arith.constant 0 : i32
    %c0_i32_1 = arith.constant 0 : i32
    return %arg0, %c0_i32, %c0_i32_0 : i32, i32, i32
  }
  func.func @transform_4(%arg0: i32) -> (i32, i32) {
    %c0_i32 = arith.constant 0 : i32
    %c0_i32_0 = arith.constant 0 : i32
    %c0_i32_1 = arith.constant 0 : i32
    return %c0_i32, %c0_i32_0 : i32, i32
  }
  func.func @transform_5(%arg0: i32) -> (i32, i32) {
    %c0_i32 = arith.constant 0 : i32
    %c0_i32_0 = arith.constant 0 : i32
    %c0_i32_1 = arith.constant 0 : i32
    return %c0_i32, %c0_i32_0 : i32, i32
  }
  func.func @transform_6(%arg0: i32) -> (i32, i32, i32) {
    %c0_i32 = arith.constant 0 : i32
    %c0_i32_0 = arith.constant 0 : i32
    %c0_i32_1 = arith.constant 0 : i32
    return %arg0, %c0_i32, %c0_i32_0 : i32, i32, i32
  }
}

module attributes {stable_mosaic.version = 11 : i64} {
  func.func @_head_kernel(%arg0: i32, %arg1: memref<1x150x25xf32, #tpu.memory_space<vmem>>, %arg2: memref<1x150x25xf32, #tpu.memory_space<vmem>>, %arg3: memref<1x150x25xf32, #tpu.memory_space<vmem>>, %arg4: memref<1x150x25xf32, #tpu.memory_space<vmem>>, %arg5: memref<1x1x10xf32, #tpu.memory_space<vmem>>, %arg6: memref<16x150xf32, #tpu.memory_space<vmem>>, %arg7: memref<16x1xf32, #tpu.memory_space<vmem>>, %arg8: memref<400x120xf32, #tpu.memory_space<vmem>>, %arg9: memref<1x120xf32, #tpu.memory_space<vmem>>, %arg10: memref<120x84xf32, #tpu.memory_space<vmem>>, %arg11: memref<1x84xf32, #tpu.memory_space<vmem>>, %arg12: memref<84x9xf32, #tpu.memory_space<vmem>>, %arg13: memref<1x9xf32, #tpu.memory_space<vmem>>, %arg14: memref<10x128xf32, #tpu.memory_space<vmem>>, %arg15: memref<1x128xf32, #tpu.memory_space<vmem>>, %arg16: memref<128x256xf32, #tpu.memory_space<vmem>>, %arg17: memref<1x256xf32, #tpu.memory_space<vmem>>, %arg18: memref<256x9xf32, #tpu.memory_space<vmem>>, %arg19: memref<1x9xf32, #tpu.memory_space<vmem>>, %arg20: memref<18x9xf32, #tpu.memory_space<vmem>>, %arg21: memref<1x9xf32, #tpu.memory_space<vmem>>, %arg22: memref<1x1x9xf32, #tpu.memory_space<vmem>>) attributes {dimension_semantics = [#tpu.dimension_semantics<parallel>], iteration_bounds = array<i64: 2>, scalar_prefetch = 0 : i64, scratch_operands = 0 : i64, tpu.core_type = #tpu.core_type<tc>, window_params = [{transform_indices = @transform_0, window_bounds = array<i64: 1, 150, 25>}, {transform_indices = @transform_1, window_bounds = array<i64: 1, 150, 25>}, {transform_indices = @transform_2, window_bounds = array<i64: 1, 150, 25>}, {transform_indices = @transform_3, window_bounds = array<i64: 1, 150, 25>}, {transform_indices = @transform_4, window_bounds = array<i64: 1, 1, 10>}, {pipeline_mode = #tpu.pipeline_mode<synchronous>, transform_indices = @transform_5, window_bounds = array<i64: 16, 150>}, {pipeline_mode = #tpu.pipeline_mode<synchronous>, transform_indices = @transform_6, window_bounds = array<i64: 16, 1>}, {pipeline_mode = #tpu.pipeline_mode<synchronous>, transform_indices = @transform_7, window_bounds = array<i64: 400, 120>}, {pipeline_mode = #tpu.pipeline_mode<synchronous>, transform_indices = @transform_8, window_bounds = array<i64: 1, 120>}, {pipeline_mode = #tpu.pipeline_mode<synchronous>, transform_indices = @transform_9, window_bounds = array<i64: 120, 84>}, {pipeline_mode = #tpu.pipeline_mode<synchronous>, transform_indices = @transform_10, window_bounds = array<i64: 1, 84>}, {pipeline_mode = #tpu.pipeline_mode<synchronous>, transform_indices = @transform_11, window_bounds = array<i64: 84, 9>}, {pipeline_mode = #tpu.pipeline_mode<synchronous>, transform_indices = @transform_12, window_bounds = array<i64: 1, 9>}, {pipeline_mode = #tpu.pipeline_mode<synchronous>, transform_indices = @transform_13, window_bounds = array<i64: 10, 128>}, {pipeline_mode = #tpu.pipeline_mode<synchronous>, transform_indices = @transform_14, window_bounds = array<i64: 1, 128>}, {pipeline_mode = #tpu.pipeline_mode<synchronous>, transform_indices = @transform_15, window_bounds = array<i64: 128, 256>}, {pipeline_mode = #tpu.pipeline_mode<synchronous>, transform_indices = @transform_16, window_bounds = array<i64: 1, 256>}, {pipeline_mode = #tpu.pipeline_mode<synchronous>, transform_indices = @transform_17, window_bounds = array<i64: 256, 9>}, {pipeline_mode = #tpu.pipeline_mode<synchronous>, transform_indices = @transform_18, window_bounds = array<i64: 1, 9>}, {pipeline_mode = #tpu.pipeline_mode<synchronous>, transform_indices = @transform_19, window_bounds = array<i64: 18, 9>}, {pipeline_mode = #tpu.pipeline_mode<synchronous>, transform_indices = @transform_20, window_bounds = array<i64: 1, 9>}, {transform_indices = @transform_21, window_bounds = array<i64: 1, 1, 9>}]} {
    %c0 = arith.constant 0 : index
    %c0_0 = arith.constant 0 : index
    %0 = vector.load %arg6[%c0, %c0_0] : memref<16x150xf32, #tpu.memory_space<vmem>>, vector<16x150xf32>
    %c0_1 = arith.constant 0 : index
    %c0_2 = arith.constant 0 : index
    %c0_3 = arith.constant 0 : index
    %1 = vector.load %arg1[%c0_1, %c0_2, %c0_3] : memref<1x150x25xf32, #tpu.memory_space<vmem>>, vector<1x150x25xf32>
    %2 = vector.shape_cast %1 : vector<1x150x25xf32> to vector<150x25xf32>
    %cst = arith.constant dense<0.000000e+00> : vector<16x25xf32>
    %3 = tpu.matmul %0, %2, %cst {dimension_numbers = #tpu.dot_dimension_numbers<[1], [0], [0], [1], [0, 0, 1, 1], [], []>} : vector<16x150xf32>, vector<150x25xf32>, vector<16x25xf32> -> vector<16x25xf32>
    %c0_4 = arith.constant 0 : index
    %c0_5 = arith.constant 0 : index
    %c0_6 = arith.constant 0 : index
    %4 = vector.load %arg2[%c0_4, %c0_5, %c0_6] : memref<1x150x25xf32, #tpu.memory_space<vmem>>, vector<1x150x25xf32>
    %5 = vector.shape_cast %4 : vector<1x150x25xf32> to vector<150x25xf32>
    %cst_7 = arith.constant dense<0.000000e+00> : vector<16x25xf32>
    %6 = tpu.matmul %0, %5, %cst_7 {dimension_numbers = #tpu.dot_dimension_numbers<[1], [0], [0], [1], [0, 0, 1, 1], [], []>} : vector<16x150xf32>, vector<150x25xf32>, vector<16x25xf32> -> vector<16x25xf32>
    %c0_8 = arith.constant 0 : index
    %c0_9 = arith.constant 0 : index
    %c0_10 = arith.constant 0 : index
    %7 = vector.load %arg3[%c0_8, %c0_9, %c0_10] : memref<1x150x25xf32, #tpu.memory_space<vmem>>, vector<1x150x25xf32>
    %8 = vector.shape_cast %7 : vector<1x150x25xf32> to vector<150x25xf32>
    %cst_11 = arith.constant dense<0.000000e+00> : vector<16x25xf32>
    %9 = tpu.matmul %0, %8, %cst_11 {dimension_numbers = #tpu.dot_dimension_numbers<[1], [0], [0], [1], [0, 0, 1, 1], [], []>} : vector<16x150xf32>, vector<150x25xf32>, vector<16x25xf32> -> vector<16x25xf32>
    %c0_12 = arith.constant 0 : index
    %c0_13 = arith.constant 0 : index
    %c0_14 = arith.constant 0 : index
    %10 = vector.load %arg4[%c0_12, %c0_13, %c0_14] : memref<1x150x25xf32, #tpu.memory_space<vmem>>, vector<1x150x25xf32>
    %11 = vector.shape_cast %10 : vector<1x150x25xf32> to vector<150x25xf32>
    %cst_15 = arith.constant dense<0.000000e+00> : vector<16x25xf32>
    %12 = tpu.matmul %0, %11, %cst_15 {dimension_numbers = #tpu.dot_dimension_numbers<[1], [0], [0], [1], [0, 0, 1, 1], [], []>} : vector<16x150xf32>, vector<150x25xf32>, vector<16x25xf32> -> vector<16x25xf32>
    %13 = arith.maximumf %3, %6 : vector<16x25xf32>
    %14 = arith.maximumf %9, %12 : vector<16x25xf32>
    %15 = arith.maximumf %13, %14 : vector<16x25xf32>
    %c0_16 = arith.constant 0 : index
    %c0_17 = arith.constant 0 : index
    %16 = vector.load %arg7[%c0_16, %c0_17] : memref<16x1xf32, #tpu.memory_space<vmem>>, vector<16x1xf32>
    %17 = vector.broadcast %16 : vector<16x1xf32> to vector<16x25xf32>
    %18 = arith.addf %15, %17 : vector<16x25xf32>
    %cst_18 = arith.constant 0.000000e+00 : f32
    %19 = vector.broadcast %cst_18 : f32 to vector<16x25xf32>
    %20 = arith.maximumf %18, %19 : vector<16x25xf32>
    %cst_19 = arith.constant 0.000000e+00 : f32
    %21 = vector.broadcast %cst_19 : f32 to vector<1x120xf32>
    %22 = vector.extract_strided_slice %20 {offsets = [0, 0], sizes = [1, 25], strides = [1, 1]} : vector<16x25xf32> to vector<1x25xf32>
    %c0_20 = arith.constant 0 : index
    %c0_21 = arith.constant 0 : index
    %23 = vector.load %arg8[%c0_20, %c0_21] : memref<400x120xf32, #tpu.memory_space<vmem>>, vector<25x120xf32>
    %cst_22 = arith.constant dense<0.000000e+00> : vector<1x120xf32>
    %24 = tpu.matmul %22, %23, %cst_22 {dimension_numbers = #tpu.dot_dimension_numbers<[1], [0], [0], [1], [0, 0, 1, 1], [], []>} : vector<1x25xf32>, vector<25x120xf32>, vector<1x120xf32> -> vector<1x120xf32>
    %25 = arith.addf %21, %24 : vector<1x120xf32>
    %26 = vector.extract_strided_slice %20 {offsets = [1, 0], sizes = [1, 25], strides = [1, 1]} : vector<16x25xf32> to vector<1x25xf32>
    %c25 = arith.constant 25 : index
    %c0_23 = arith.constant 0 : index
    %27 = vector.load %arg8[%c25, %c0_23] : memref<400x120xf32, #tpu.memory_space<vmem>>, vector<25x120xf32>
    %cst_24 = arith.constant dense<0.000000e+00> : vector<1x120xf32>
    %28 = tpu.matmul %26, %27, %cst_24 {dimension_numbers = #tpu.dot_dimension_numbers<[1], [0], [0], [1], [0, 0, 1, 1], [], []>} : vector<1x25xf32>, vector<25x120xf32>, vector<1x120xf32> -> vector<1x120xf32>
    %29 = arith.addf %25, %28 : vector<1x120xf32>
    %30 = vector.extract_strided_slice %20 {offsets = [2, 0], sizes = [1, 25], strides = [1, 1]} : vector<16x25xf32> to vector<1x25xf32>
    %c50 = arith.constant 50 : index
    %c0_25 = arith.constant 0 : index
    %31 = vector.load %arg8[%c50, %c0_25] : memref<400x120xf32, #tpu.memory_space<vmem>>, vector<25x120xf32>
    %cst_26 = arith.constant dense<0.000000e+00> : vector<1x120xf32>
    %32 = tpu.matmul %30, %31, %cst_26 {dimension_numbers = #tpu.dot_dimension_numbers<[1], [0], [0], [1], [0, 0, 1, 1], [], []>} : vector<1x25xf32>, vector<25x120xf32>, vector<1x120xf32> -> vector<1x120xf32>
    %33 = arith.addf %29, %32 : vector<1x120xf32>
    %34 = vector.extract_strided_slice %20 {offsets = [3, 0], sizes = [1, 25], strides = [1, 1]} : vector<16x25xf32> to vector<1x25xf32>
    %c75 = arith.constant 75 : index
    %c0_27 = arith.constant 0 : index
    %35 = vector.load %arg8[%c75, %c0_27] : memref<400x120xf32, #tpu.memory_space<vmem>>, vector<25x120xf32>
    %cst_28 = arith.constant dense<0.000000e+00> : vector<1x120xf32>
    %36 = tpu.matmul %34, %35, %cst_28 {dimension_numbers = #tpu.dot_dimension_numbers<[1], [0], [0], [1], [0, 0, 1, 1], [], []>} : vector<1x25xf32>, vector<25x120xf32>, vector<1x120xf32> -> vector<1x120xf32>
    %37 = arith.addf %33, %36 : vector<1x120xf32>
    %38 = vector.extract_strided_slice %20 {offsets = [4, 0], sizes = [1, 25], strides = [1, 1]} : vector<16x25xf32> to vector<1x25xf32>
    %c100 = arith.constant 100 : index
    %c0_29 = arith.constant 0 : index
    %39 = vector.load %arg8[%c100, %c0_29] : memref<400x120xf32, #tpu.memory_space<vmem>>, vector<25x120xf32>
    %cst_30 = arith.constant dense<0.000000e+00> : vector<1x120xf32>
    %40 = tpu.matmul %38, %39, %cst_30 {dimension_numbers = #tpu.dot_dimension_numbers<[1], [0], [0], [1], [0, 0, 1, 1], [], []>} : vector<1x25xf32>, vector<25x120xf32>, vector<1x120xf32> -> vector<1x120xf32>
    %41 = arith.addf %37, %40 : vector<1x120xf32>
    %42 = vector.extract_strided_slice %20 {offsets = [5, 0], sizes = [1, 25], strides = [1, 1]} : vector<16x25xf32> to vector<1x25xf32>
    %c125 = arith.constant 125 : index
    %c0_31 = arith.constant 0 : index
    %43 = vector.load %arg8[%c125, %c0_31] : memref<400x120xf32, #tpu.memory_space<vmem>>, vector<25x120xf32>
    %cst_32 = arith.constant dense<0.000000e+00> : vector<1x120xf32>
    %44 = tpu.matmul %42, %43, %cst_32 {dimension_numbers = #tpu.dot_dimension_numbers<[1], [0], [0], [1], [0, 0, 1, 1], [], []>} : vector<1x25xf32>, vector<25x120xf32>, vector<1x120xf32> -> vector<1x120xf32>
    %45 = arith.addf %41, %44 : vector<1x120xf32>
    %46 = vector.extract_strided_slice %20 {offsets = [6, 0], sizes = [1, 25], strides = [1, 1]} : vector<16x25xf32> to vector<1x25xf32>
    %c150 = arith.constant 150 : index
    %c0_33 = arith.constant 0 : index
    %47 = vector.load %arg8[%c150, %c0_33] : memref<400x120xf32, #tpu.memory_space<vmem>>, vector<25x120xf32>
    %cst_34 = arith.constant dense<0.000000e+00> : vector<1x120xf32>
    %48 = tpu.matmul %46, %47, %cst_34 {dimension_numbers = #tpu.dot_dimension_numbers<[1], [0], [0], [1], [0, 0, 1, 1], [], []>} : vector<1x25xf32>, vector<25x120xf32>, vector<1x120xf32> -> vector<1x120xf32>
    %49 = arith.addf %45, %48 : vector<1x120xf32>
    %50 = vector.extract_strided_slice %20 {offsets = [7, 0], sizes = [1, 25], strides = [1, 1]} : vector<16x25xf32> to vector<1x25xf32>
    %c175 = arith.constant 175 : index
    %c0_35 = arith.constant 0 : index
    %51 = vector.load %arg8[%c175, %c0_35] : memref<400x120xf32, #tpu.memory_space<vmem>>, vector<25x120xf32>
    %cst_36 = arith.constant dense<0.000000e+00> : vector<1x120xf32>
    %52 = tpu.matmul %50, %51, %cst_36 {dimension_numbers = #tpu.dot_dimension_numbers<[1], [0], [0], [1], [0, 0, 1, 1], [], []>} : vector<1x25xf32>, vector<25x120xf32>, vector<1x120xf32> -> vector<1x120xf32>
    %53 = arith.addf %49, %52 : vector<1x120xf32>
    %54 = vector.extract_strided_slice %20 {offsets = [8, 0], sizes = [1, 25], strides = [1, 1]} : vector<16x25xf32> to vector<1x25xf32>
    %c200 = arith.constant 200 : index
    %c0_37 = arith.constant 0 : index
    %55 = vector.load %arg8[%c200, %c0_37] : memref<400x120xf32, #tpu.memory_space<vmem>>, vector<25x120xf32>
    %cst_38 = arith.constant dense<0.000000e+00> : vector<1x120xf32>
    %56 = tpu.matmul %54, %55, %cst_38 {dimension_numbers = #tpu.dot_dimension_numbers<[1], [0], [0], [1], [0, 0, 1, 1], [], []>} : vector<1x25xf32>, vector<25x120xf32>, vector<1x120xf32> -> vector<1x120xf32>
    %57 = arith.addf %53, %56 : vector<1x120xf32>
    %58 = vector.extract_strided_slice %20 {offsets = [9, 0], sizes = [1, 25], strides = [1, 1]} : vector<16x25xf32> to vector<1x25xf32>
    %c225 = arith.constant 225 : index
    %c0_39 = arith.constant 0 : index
    %59 = vector.load %arg8[%c225, %c0_39] : memref<400x120xf32, #tpu.memory_space<vmem>>, vector<25x120xf32>
    %cst_40 = arith.constant dense<0.000000e+00> : vector<1x120xf32>
    %60 = tpu.matmul %58, %59, %cst_40 {dimension_numbers = #tpu.dot_dimension_numbers<[1], [0], [0], [1], [0, 0, 1, 1], [], []>} : vector<1x25xf32>, vector<25x120xf32>, vector<1x120xf32> -> vector<1x120xf32>
    %61 = arith.addf %57, %60 : vector<1x120xf32>
    %62 = vector.extract_strided_slice %20 {offsets = [10, 0], sizes = [1, 25], strides = [1, 1]} : vector<16x25xf32> to vector<1x25xf32>
    %c250 = arith.constant 250 : index
    %c0_41 = arith.constant 0 : index
    %63 = vector.load %arg8[%c250, %c0_41] : memref<400x120xf32, #tpu.memory_space<vmem>>, vector<25x120xf32>
    %cst_42 = arith.constant dense<0.000000e+00> : vector<1x120xf32>
    %64 = tpu.matmul %62, %63, %cst_42 {dimension_numbers = #tpu.dot_dimension_numbers<[1], [0], [0], [1], [0, 0, 1, 1], [], []>} : vector<1x25xf32>, vector<25x120xf32>, vector<1x120xf32> -> vector<1x120xf32>
    %65 = arith.addf %61, %64 : vector<1x120xf32>
    %66 = vector.extract_strided_slice %20 {offsets = [11, 0], sizes = [1, 25], strides = [1, 1]} : vector<16x25xf32> to vector<1x25xf32>
    %c275 = arith.constant 275 : index
    %c0_43 = arith.constant 0 : index
    %67 = vector.load %arg8[%c275, %c0_43] : memref<400x120xf32, #tpu.memory_space<vmem>>, vector<25x120xf32>
    %cst_44 = arith.constant dense<0.000000e+00> : vector<1x120xf32>
    %68 = tpu.matmul %66, %67, %cst_44 {dimension_numbers = #tpu.dot_dimension_numbers<[1], [0], [0], [1], [0, 0, 1, 1], [], []>} : vector<1x25xf32>, vector<25x120xf32>, vector<1x120xf32> -> vector<1x120xf32>
    %69 = arith.addf %65, %68 : vector<1x120xf32>
    %70 = vector.extract_strided_slice %20 {offsets = [12, 0], sizes = [1, 25], strides = [1, 1]} : vector<16x25xf32> to vector<1x25xf32>
    %c300 = arith.constant 300 : index
    %c0_45 = arith.constant 0 : index
    %71 = vector.load %arg8[%c300, %c0_45] : memref<400x120xf32, #tpu.memory_space<vmem>>, vector<25x120xf32>
    %cst_46 = arith.constant dense<0.000000e+00> : vector<1x120xf32>
    %72 = tpu.matmul %70, %71, %cst_46 {dimension_numbers = #tpu.dot_dimension_numbers<[1], [0], [0], [1], [0, 0, 1, 1], [], []>} : vector<1x25xf32>, vector<25x120xf32>, vector<1x120xf32> -> vector<1x120xf32>
    %73 = arith.addf %69, %72 : vector<1x120xf32>
    %74 = vector.extract_strided_slice %20 {offsets = [13, 0], sizes = [1, 25], strides = [1, 1]} : vector<16x25xf32> to vector<1x25xf32>
    %c325 = arith.constant 325 : index
    %c0_47 = arith.constant 0 : index
    %75 = vector.load %arg8[%c325, %c0_47] : memref<400x120xf32, #tpu.memory_space<vmem>>, vector<25x120xf32>
    %cst_48 = arith.constant dense<0.000000e+00> : vector<1x120xf32>
    %76 = tpu.matmul %74, %75, %cst_48 {dimension_numbers = #tpu.dot_dimension_numbers<[1], [0], [0], [1], [0, 0, 1, 1], [], []>} : vector<1x25xf32>, vector<25x120xf32>, vector<1x120xf32> -> vector<1x120xf32>
    %77 = arith.addf %73, %76 : vector<1x120xf32>
    %78 = vector.extract_strided_slice %20 {offsets = [14, 0], sizes = [1, 25], strides = [1, 1]} : vector<16x25xf32> to vector<1x25xf32>
    %c350 = arith.constant 350 : index
    %c0_49 = arith.constant 0 : index
    %79 = vector.load %arg8[%c350, %c0_49] : memref<400x120xf32, #tpu.memory_space<vmem>>, vector<25x120xf32>
    %cst_50 = arith.constant dense<0.000000e+00> : vector<1x120xf32>
    %80 = tpu.matmul %78, %79, %cst_50 {dimension_numbers = #tpu.dot_dimension_numbers<[1], [0], [0], [1], [0, 0, 1, 1], [], []>} : vector<1x25xf32>, vector<25x120xf32>, vector<1x120xf32> -> vector<1x120xf32>
    %81 = arith.addf %77, %80 : vector<1x120xf32>
    %82 = vector.extract_strided_slice %20 {offsets = [15, 0], sizes = [1, 25], strides = [1, 1]} : vector<16x25xf32> to vector<1x25xf32>
    %c375 = arith.constant 375 : index
    %c0_51 = arith.constant 0 : index
    %83 = vector.load %arg8[%c375, %c0_51] : memref<400x120xf32, #tpu.memory_space<vmem>>, vector<25x120xf32>
    %cst_52 = arith.constant dense<0.000000e+00> : vector<1x120xf32>
    %84 = tpu.matmul %82, %83, %cst_52 {dimension_numbers = #tpu.dot_dimension_numbers<[1], [0], [0], [1], [0, 0, 1, 1], [], []>} : vector<1x25xf32>, vector<25x120xf32>, vector<1x120xf32> -> vector<1x120xf32>
    %85 = arith.addf %81, %84 : vector<1x120xf32>
    %c0_53 = arith.constant 0 : index
    %c0_54 = arith.constant 0 : index
    %86 = vector.load %arg9[%c0_53, %c0_54] : memref<1x120xf32, #tpu.memory_space<vmem>>, vector<1x120xf32>
    %87 = arith.addf %85, %86 : vector<1x120xf32>
    %cst_55 = arith.constant 0.000000e+00 : f32
    %88 = vector.broadcast %cst_55 : f32 to vector<1x120xf32>
    %89 = arith.maximumf %87, %88 : vector<1x120xf32>
    %c0_56 = arith.constant 0 : index
    %c0_57 = arith.constant 0 : index
    %90 = vector.load %arg10[%c0_56, %c0_57] : memref<120x84xf32, #tpu.memory_space<vmem>>, vector<120x84xf32>
    %cst_58 = arith.constant dense<0.000000e+00> : vector<1x84xf32>
    %91 = tpu.matmul %89, %90, %cst_58 {dimension_numbers = #tpu.dot_dimension_numbers<[1], [0], [0], [1], [0, 0, 1, 1], [], []>} : vector<1x120xf32>, vector<120x84xf32>, vector<1x84xf32> -> vector<1x84xf32>
    %c0_59 = arith.constant 0 : index
    %c0_60 = arith.constant 0 : index
    %92 = vector.load %arg11[%c0_59, %c0_60] : memref<1x84xf32, #tpu.memory_space<vmem>>, vector<1x84xf32>
    %93 = arith.addf %91, %92 : vector<1x84xf32>
    %cst_61 = arith.constant 0.000000e+00 : f32
    %94 = vector.broadcast %cst_61 : f32 to vector<1x84xf32>
    %95 = arith.maximumf %93, %94 : vector<1x84xf32>
    %c0_62 = arith.constant 0 : index
    %c0_63 = arith.constant 0 : index
    %96 = vector.load %arg12[%c0_62, %c0_63] : memref<84x9xf32, #tpu.memory_space<vmem>>, vector<84x9xf32>
    %cst_64 = arith.constant dense<0.000000e+00> : vector<1x9xf32>
    %97 = tpu.matmul %95, %96, %cst_64 {dimension_numbers = #tpu.dot_dimension_numbers<[1], [0], [0], [1], [0, 0, 1, 1], [], []>} : vector<1x84xf32>, vector<84x9xf32>, vector<1x9xf32> -> vector<1x9xf32>
    %c0_65 = arith.constant 0 : index
    %c0_66 = arith.constant 0 : index
    %98 = vector.load %arg13[%c0_65, %c0_66] : memref<1x9xf32, #tpu.memory_space<vmem>>, vector<1x9xf32>
    %99 = arith.addf %97, %98 : vector<1x9xf32>
    %c0_67 = arith.constant 0 : index
    %c0_68 = arith.constant 0 : index
    %c0_69 = arith.constant 0 : index
    %100 = vector.load %arg5[%c0_67, %c0_68, %c0_69] : memref<1x1x10xf32, #tpu.memory_space<vmem>>, vector<1x1x10xf32>
    %101 = vector.shape_cast %100 : vector<1x1x10xf32> to vector<1x10xf32>
    %c0_70 = arith.constant 0 : index
    %c0_71 = arith.constant 0 : index
    %102 = vector.load %arg14[%c0_70, %c0_71] : memref<10x128xf32, #tpu.memory_space<vmem>>, vector<10x128xf32>
    %cst_72 = arith.constant dense<0.000000e+00> : vector<1x128xf32>
    %103 = tpu.matmul %101, %102, %cst_72 {dimension_numbers = #tpu.dot_dimension_numbers<[1], [0], [0], [1], [0, 0, 1, 1], [], []>} : vector<1x10xf32>, vector<10x128xf32>, vector<1x128xf32> -> vector<1x128xf32>
    %c0_73 = arith.constant 0 : index
    %c0_74 = arith.constant 0 : index
    %104 = vector.load %arg15[%c0_73, %c0_74] : memref<1x128xf32, #tpu.memory_space<vmem>>, vector<1x128xf32>
    %105 = arith.addf %103, %104 : vector<1x128xf32>
    %cst_75 = arith.constant 0.000000e+00 : f32
    %106 = vector.broadcast %cst_75 : f32 to vector<1x128xf32>
    %107 = arith.maximumf %105, %106 : vector<1x128xf32>
    %c0_76 = arith.constant 0 : index
    %c0_77 = arith.constant 0 : index
    %108 = vector.load %arg16[%c0_76, %c0_77] : memref<128x256xf32, #tpu.memory_space<vmem>>, vector<128x256xf32>
    %cst_78 = arith.constant dense<0.000000e+00> : vector<1x256xf32>
    %109 = tpu.matmul %107, %108, %cst_78 {dimension_numbers = #tpu.dot_dimension_numbers<[1], [0], [0], [1], [0, 0, 1, 1], [], []>} : vector<1x128xf32>, vector<128x256xf32>, vector<1x256xf32> -> vector<1x256xf32>
    %c0_79 = arith.constant 0 : index
    %c0_80 = arith.constant 0 : index
    %110 = vector.load %arg17[%c0_79, %c0_80] : memref<1x256xf32, #tpu.memory_space<vmem>>, vector<1x256xf32>
    %111 = arith.addf %109, %110 : vector<1x256xf32>
    %cst_81 = arith.constant 0.000000e+00 : f32
    %112 = vector.broadcast %cst_81 : f32 to vector<1x256xf32>
    %113 = arith.maximumf %111, %112 : vector<1x256xf32>
    %c0_82 = arith.constant 0 : index
    %c0_83 = arith.constant 0 : index
    %114 = vector.load %arg18[%c0_82, %c0_83] : memref<256x9xf32, #tpu.memory_space<vmem>>, vector<256x9xf32>
    %cst_84 = arith.constant dense<0.000000e+00> : vector<1x9xf32>
    %115 = tpu.matmul %113, %114, %cst_84 {dimension_numbers = #tpu.dot_dimension_numbers<[1], [0], [0], [1], [0, 0, 1, 1], [], []>} : vector<1x256xf32>, vector<256x9xf32>, vector<1x9xf32> -> vector<1x9xf32>
    %c0_85 = arith.constant 0 : index
    %c0_86 = arith.constant 0 : index
    %116 = vector.load %arg19[%c0_85, %c0_86] : memref<1x9xf32, #tpu.memory_space<vmem>>, vector<1x9xf32>
    %117 = arith.addf %115, %116 : vector<1x9xf32>
    %c0_87 = arith.constant 0 : index
    %c0_88 = arith.constant 0 : index
    %118 = vector.load %arg20[%c0_87, %c0_88] : memref<18x9xf32, #tpu.memory_space<vmem>>, vector<9x9xf32>
    %cst_89 = arith.constant dense<0.000000e+00> : vector<1x9xf32>
    %119 = tpu.matmul %117, %118, %cst_89 {dimension_numbers = #tpu.dot_dimension_numbers<[1], [0], [0], [1], [0, 0, 1, 1], [], []>} : vector<1x9xf32>, vector<9x9xf32>, vector<1x9xf32> -> vector<1x9xf32>
    %c9 = arith.constant 9 : index
    %c0_90 = arith.constant 0 : index
    %120 = vector.load %arg20[%c9, %c0_90] : memref<18x9xf32, #tpu.memory_space<vmem>>, vector<9x9xf32>
    %cst_91 = arith.constant dense<0.000000e+00> : vector<1x9xf32>
    %121 = tpu.matmul %99, %120, %cst_91 {dimension_numbers = #tpu.dot_dimension_numbers<[1], [0], [0], [1], [0, 0, 1, 1], [], []>} : vector<1x9xf32>, vector<9x9xf32>, vector<1x9xf32> -> vector<1x9xf32>
    %122 = arith.addf %119, %121 : vector<1x9xf32>
    %c0_92 = arith.constant 0 : index
    %c0_93 = arith.constant 0 : index
    %123 = vector.load %arg21[%c0_92, %c0_93] : memref<1x9xf32, #tpu.memory_space<vmem>>, vector<1x9xf32>
    %124 = arith.addf %122, %123 : vector<1x9xf32>
    %c0_94 = arith.constant 0 : index
    %c0_95 = arith.constant 0 : index
    %c0_96 = arith.constant 0 : index
    %125 = vector.load %arg22[%c0_94, %c0_95, %c0_96] : memref<1x1x9xf32, #tpu.memory_space<vmem>>, vector<1x1x9xf32>
    %126 = vector.shape_cast %125 : vector<1x1x9xf32> to vector<1x9xf32>
    %127 = vector.shape_cast %124 : vector<1x9xf32> to vector<1x1x9xf32>
    tpu.vector_store %arg22[%c0_94, %c0_95, %c0_96], %127 {strides = array<i32>} : memref<1x1x9xf32, #tpu.memory_space<vmem>>, vector<1x1x9xf32>,
    return
  }
  func.func @transform_0(%arg0: i32) -> (i32, i32, i32) {
    %c0_i32 = arith.constant 0 : i32
    %c0_i32_0 = arith.constant 0 : i32
    %c0_i32_1 = arith.constant 0 : i32
    return %arg0, %c0_i32, %c0_i32_0 : i32, i32, i32
  }
  func.func @transform_1(%arg0: i32) -> (i32, i32, i32) {
    %c0_i32 = arith.constant 0 : i32
    %c0_i32_0 = arith.constant 0 : i32
    %c0_i32_1 = arith.constant 0 : i32
    return %arg0, %c0_i32, %c0_i32_0 : i32, i32, i32
  }
  func.func @transform_2(%arg0: i32) -> (i32, i32, i32) {
    %c0_i32 = arith.constant 0 : i32
    %c0_i32_0 = arith.constant 0 : i32
    %c0_i32_1 = arith.constant 0 : i32
    return %arg0, %c0_i32, %c0_i32_0 : i32, i32, i32
  }
  func.func @transform_3(%arg0: i32) -> (i32, i32, i32) {
    %c0_i32 = arith.constant 0 : i32
    %c0_i32_0 = arith.constant 0 : i32
    %c0_i32_1 = arith.constant 0 : i32
    return %arg0, %c0_i32, %c0_i32_0 : i32, i32, i32
  }
  func.func @transform_4(%arg0: i32) -> (i32, i32, i32) {
    %c0_i32 = arith.constant 0 : i32
    %c0_i32_0 = arith.constant 0 : i32
    %c0_i32_1 = arith.constant 0 : i32
    return %arg0, %c0_i32, %c0_i32_0 : i32, i32, i32
  }
  func.func @transform_5(%arg0: i32) -> (i32, i32) {
    %c0_i32 = arith.constant 0 : i32
    %c0_i32_0 = arith.constant 0 : i32
    %c0_i32_1 = arith.constant 0 : i32
    return %c0_i32, %c0_i32_0 : i32, i32
  }
  func.func @transform_6(%arg0: i32) -> (i32, i32) {
    %c0_i32 = arith.constant 0 : i32
    %c0_i32_0 = arith.constant 0 : i32
    %c0_i32_1 = arith.constant 0 : i32
    return %c0_i32, %c0_i32_0 : i32, i32
  }
  func.func @transform_7(%arg0: i32) -> (i32, i32) {
    %c0_i32 = arith.constant 0 : i32
    %c0_i32_0 = arith.constant 0 : i32
    %c0_i32_1 = arith.constant 0 : i32
    return %c0_i32, %c0_i32_0 : i32, i32
  }
  func.func @transform_8(%arg0: i32) -> (i32, i32) {
    %c0_i32 = arith.constant 0 : i32
    %c0_i32_0 = arith.constant 0 : i32
    %c0_i32_1 = arith.constant 0 : i32
    return %c0_i32, %c0_i32_0 : i32, i32
  }
  func.func @transform_9(%arg0: i32) -> (i32, i32) {
    %c0_i32 = arith.constant 0 : i32
    %c0_i32_0 = arith.constant 0 : i32
    %c0_i32_1 = arith.constant 0 : i32
    return %c0_i32, %c0_i32_0 : i32, i32
  }
  func.func @transform_10(%arg0: i32) -> (i32, i32) {
    %c0_i32 = arith.constant 0 : i32
    %c0_i32_0 = arith.constant 0 : i32
    %c0_i32_1 = arith.constant 0 : i32
    return %c0_i32, %c0_i32_0 : i32, i32
  }
  func.func @transform_11(%arg0: i32) -> (i32, i32) {
    %c0_i32 = arith.constant 0 : i32
    %c0_i32_0 = arith.constant 0 : i32
    %c0_i32_1 = arith.constant 0 : i32
    return %c0_i32, %c0_i32_0 : i32, i32
  }
  func.func @transform_12(%arg0: i32) -> (i32, i32) {
    %c0_i32 = arith.constant 0 : i32
    %c0_i32_0 = arith.constant 0 : i32
    %c0_i32_1 = arith.constant 0 : i32
    return %c0_i32, %c0_i32_0 : i32, i32
  }
  func.func @transform_13(%arg0: i32) -> (i32, i32) {
    %c0_i32 = arith.constant 0 : i32
    %c0_i32_0 = arith.constant 0 : i32
    %c0_i32_1 = arith.constant 0 : i32
    return %c0_i32, %c0_i32_0 : i32, i32
  }
  func.func @transform_14(%arg0: i32) -> (i32, i32) {
    %c0_i32 = arith.constant 0 : i32
    %c0_i32_0 = arith.constant 0 : i32
    %c0_i32_1 = arith.constant 0 : i32
    return %c0_i32, %c0_i32_0 : i32, i32
  }
  func.func @transform_15(%arg0: i32) -> (i32, i32) {
    %c0_i32 = arith.constant 0 : i32
    %c0_i32_0 = arith.constant 0 : i32
    %c0_i32_1 = arith.constant 0 : i32
    return %c0_i32, %c0_i32_0 : i32, i32
  }
  func.func @transform_16(%arg0: i32) -> (i32, i32) {
    %c0_i32 = arith.constant 0 : i32
    %c0_i32_0 = arith.constant 0 : i32
    %c0_i32_1 = arith.constant 0 : i32
    return %c0_i32, %c0_i32_0 : i32, i32
  }
  func.func @transform_17(%arg0: i32) -> (i32, i32) {
    %c0_i32 = arith.constant 0 : i32
    %c0_i32_0 = arith.constant 0 : i32
    %c0_i32_1 = arith.constant 0 : i32
    return %c0_i32, %c0_i32_0 : i32, i32
  }
  func.func @transform_18(%arg0: i32) -> (i32, i32) {
    %c0_i32 = arith.constant 0 : i32
    %c0_i32_0 = arith.constant 0 : i32
    %c0_i32_1 = arith.constant 0 : i32
    return %c0_i32, %c0_i32_0 : i32, i32
  }
  func.func @transform_19(%arg0: i32) -> (i32, i32) {
    %c0_i32 = arith.constant 0 : i32
    %c0_i32_0 = arith.constant 0 : i32
    %c0_i32_1 = arith.constant 0 : i32
    return %c0_i32, %c0_i32_0 : i32, i32
  }
  func.func @transform_20(%arg0: i32) -> (i32, i32) {
    %c0_i32 = arith.constant 0 : i32
    %c0_i32_0 = arith.constant 0 : i32
    %c0_i32_1 = arith.constant 0 : i32
    return %c0_i32, %c0_i32_0 : i32, i32
  }
  func.func @transform_21(%arg0: i32) -> (i32, i32, i32) {
    %c0_i32 = arith.constant 0 : i32
    %c0_i32_0 = arith.constant 0 : i32
    %c0_i32_1 = arith.constant 0 : i32
    return %arg0, %c0_i32, %c0_i32_0 : i32, i32, i32
  }
}

</mosaic_0001>

<bundles_post_ra>
// kernel: net_forward.2
= control target key start
LH: loop header
LB: loop body
LE: loop exit
PB: predicated region body
PF: predicated region fallthrough
CT: control target
= control target key end

     0   :  { %s989_s21 = smov 0   ;;  %s1153_s0 = inlined_call_operand.vmem [shape: f32[2,75,196], index: 0, kind: input, shape index: {}]   ;;  %s1154_s1 = inlined_call_operand.vmem [shape: f32[2,75,196], index: 1, kind: input, shape index: {}]   ;;  %s1155_s2 = inlined_call_operand.vmem [shape: f32[2,75,196], index: 2, kind: input, shape index: {}]   ;;  %s1156_s3 = inlined_call_operand.vmem [shape: f32[2,75,196], index: 3, kind: input, shape index: {}]   ;;  %s1157_s4 = inlined_call_operand.vmem [shape: f32[6,75], index: 4, kind: input, shape index: {}]   ;;  %s1158_s5 = inlined_call_operand.vmem [shape: f32[6,1], index: 5, kind: input, shape index: {}]   ;;  %s1159_s6 = inlined_call_operand.vmem [shape: f32[2,6,196], index: 6, kind: output, shape index: {}]  }
   0x1 LB: > { %s816_s22 = sadd.s32 4294967295, %s949_s21   ;;  %p820_p0 = scmp.ge.s32.totalorder %s949_s21, 1  ;;  %s949_s21 = sphi %s989_s21, %s16_s21  }
   0x2   : > { %p242_p1 = scmp.lt.s32.totalorder %s949_s21, 3 }
   0x4   : > { %p243_p2 = pnand %p820_p0, %p242_p1 }
   0x5   : > { %p287_p3 = scmp.lt.s32.totalorder (!%p243_p2), %s816_s22, 1  ;;  %v951_v0 = vmov (!%p243_p2), 0.0   ;;  %v712_v1 = vld [vmem:[%s1158_s5] sm:$0x3f] (!%p243_p2)  ;;  %v952_v2 = vmov (!%p243_p2), 0   ;;  %vm337_vm0 = vcmask (!%p243_p2), 1042432  }
   0x6   : > { %246 = sbr.rel (%p243_p2) target bundleno = 283 (0x11b), region = 44  ;;  %408 = vmatprep.mubr.f32.mxu0 (!%p243_p2), %v951_v0  ;;  %505 = vmatprep.mubr.f32.mxu1 (!%p243_p2), %v951_v0  ;;  %vm953_vm1 = vmmov (!%p243_p2), 1   ;;  %vm333_vm3 = vcmask (!%p243_p2), 613376   ;;  %vm723_vm4 = vcmask (!%p243_p2), 553984  }
   0x7   : > { %942 = vset.pattern.permute.xlu0 (!%p243_p2), %v952_v2  ;;  %vm1061_vm2 = vmpackc.low (!%p243_p2), %vm337_vm0, %vm953_vm1 }
   0x8   : > { %715 = vperm.xlu0 (!%p243_p2), %942, %v712_v1  }
   0xd   : > { %s1163_s22 = smov (!%p287_p3, %s816_s22), 1 }
   0xe   : > { %s1005_s25 = smul.u32 160, %s1163_s22  ;;  %s841_s16 = sshll.u32 %s1163_s22, 4 }
   0xf   : > { %s311_s19 = scalar_lea.vmem %s1159_s6, %s841_s16 }
  0x10   : > { %s1011_s28 = scalar_lea.vmem %s1153_s0, %s1005_s25  ;;  %s1017_s7 = scalar_lea.vmem %s1154_s1, %s1005_s25 }
  0x11   : > { %v314_v3 = vld [vmem:[%s1011_s28 + $0x8] sm:$0xff]  ;;  %v316_v4 = vld [vmem:[%s1011_s28 + $0x18] sm:$0xff]  ;;  %v313_v8 = vld [vmem:[%s1011_s28] sm:$0xff]  ;;  %s1059_s10 = scalar_lea.vmem %s1155_s2, %s1005_s25  ;;  %s1069_s13 = scalar_lea.vmem %s1156_s3, %s1005_s25 }
  0x12   : > { %v416_v5 = vld [vmem:[%s1017_s7 + $0x8] sm:$0xff]  ;;  %v842_v6 = vpack.c.bf16 %v316_v4, %v314_v3  ;;  %v418_v7 = vld [vmem:[%s1017_s7 + $0x18] sm:$0xff]  ;;  %v315_v9 = vld [vmem:[%s1011_s28 + $0x10] sm:$0xff] }
  0x13   : > { %v864_v10 = vpack.c.bf16 %v418_v7, %v416_v5  ;;  %v844_v11 = vpack.c.bf16 %v315_v9, %v313_v8  ;;  %v415_v12 = vld [vmem:[%s1017_s7] sm:$0xff]  ;;  %v417_v13 = vld [vmem:[%s1017_s7 + $0x10] sm:$0xff]  ;;  %v318_v14 = vld [vmem:[%s1011_s28 + $0x28] sm:$0xff] }
  0x14   : > { %843 = vmatprep.subr.bf16.mxu0 %v842_v6  ;;  %v866_v15 = vpack.c.bf16 %v417_v13, %v415_v12  ;;  %v320_v16 = vld [vmem:[%s1011_s28 + $0x38] sm:$0xff]  ;;  %v420_v17 = vld [vmem:[%s1017_s7 + $0x28] sm:$0xff]  ;;  %v317_v21 = vld [vmem:[%s1011_s28 + $0x20] sm:$0xff] }
  0x15   : > { %v422_v18 = vld [vmem:[%s1017_s7 + $0x38] sm:$0xff]  ;;  %865 = vmatprep.subr.bf16.mxu1 %v864_v10  ;;  %845 = vmatpush1.bf16.msra.mxu0 %v844_v11  ;;  %v846_v19 = vpack.c.bf16 %v320_v16, %v318_v14  ;;  %v319_v22 = vld [vmem:[%s1011_s28 + $0x30] sm:$0xff]  ;;  %v419_v23 = vld [vmem:[%s1017_s7 + $0x20] sm:$0xff] }
  0x16   : > { %v868_v20 = vpack.c.bf16 %v422_v18, %v420_v17  ;;  %867 = vmatpush1.bf16.msra.mxu1 %v866_v15  ;;  %v848_v24 = vpack.c.bf16 %v319_v22, %v317_v21  ;;  %v421_v25 = vld [vmem:[%s1017_s7 + $0x30] sm:$0xff]  ;;  %v322_v26 = vld [vmem:[%s1011_s28 + $0x48] sm:$0xff]  ;;  %v324_v27 = vld [vmem:[%s1011_s28 + $0x58] sm:$0xff] }
  0x17   : > { %847 = vmatprep.subr.bf16.mxu0 %v846_v19  ;;  %v870_v28 = vpack.c.bf16 %v421_v25, %v419_v23  ;;  %v850_v29 = vpack.c.bf16 %v324_v27, %v322_v26  ;;  %v424_v30 = vld [vmem:[%s1017_s7 + $0x48] sm:$0xff]  ;;  %v426_v31 = vld [vmem:[%s1017_s7 + $0x58] sm:$0xff]  ;;  %v321_v32 = vld [vmem:[%s1011_s28 + $0x40] sm:$0xff] }
  0x18   : > { %869 = vmatprep.subr.bf16.mxu1 %v868_v20  ;;  %v872_v33 = vpack.c.bf16 %v426_v31, %v424_v30  ;;  %v323_v34 = vld [vmem:[%s1011_s28 + $0x50] sm:$0xff]  ;;  %v423_v35 = vld [vmem:[%s1017_s7 + $0x40] sm:$0xff]  ;;  %v326_v38 = vld [vmem:[%s1011_s28 + $0x68] sm:$0xff] }
  0x19   : > { %v425_v36 = vld [vmem:[%s1017_s7 + $0x50] sm:$0xff]  ;;  %849 = vmatpush1.bf16.msra.mxu0 %v848_v24  ;;  %v852_v37 = vpack.c.bf16 %v323_v34, %v321_v32  ;;  %v328_v39 = vld [vmem:[%s1011_s28 + $0x78] sm:$0xff]  ;;  %v428_v40 = vld [vmem:[%s1017_s7 + $0x68] sm:$0xff] }
  0x1a   : > { %871 = vmatpush1.bf16.msra.mxu1 %v870_v28  ;;  %851 = vmatprep.subr.bf16.mxu0 %v850_v29  ;;  %v874_v41 = vpack.c.bf16 %v425_v36, %v423_v35  ;;  %v854_v42 = vpack.c.bf16 %v328_v39, %v326_v38  ;;  %v430_v43 = vld [vmem:[%s1017_s7 + $0x78] sm:$0xff]  ;;  %v325_v44 = vld [vmem:[%s1011_s28 + $0x60] sm:$0xff]  ;;  %v327_v45 = vld [vmem:[%s1011_s28 + $0x70] sm:$0xff] }
  0x1b   : > { %873 = vmatprep.subr.bf16.mxu1 %v872_v33  ;;  %v876_v46 = vpack.c.bf16 %v430_v43, %v428_v40  ;;  %v427_v47 = vld [vmem:[%s1017_s7 + $0x60] sm:$0xff]  ;;  %v429_v48 = vld [vmem:[%s1017_s7 + $0x70] sm:$0xff]  ;;  %v330_v49 = vld [vmem:[%s1011_s28 + $0x88] sm:$0xff]  ;;  %v856_v53 = vpack.c.bf16 %v327_v45, %v325_v44 }
  0x1c   : > { %v332_v50 = vld [vmem:[%s1011_s28 + $0x98] sm:$0x7]  ;;  %v432_v51 = vld [vmem:[%s1017_s7 + $0x88] sm:$0xff]  ;;  %v878_v55 = vpack.c.bf16 %v429_v48, %v427_v47  ;;  %v329_v57 = vld [vmem:[%s1011_s28 + $0x80] sm:$0xff] }
  0x1d   : > { %v434_v52 = vld [vmem:[%s1017_s7 + $0x98] sm:$0x7]  ;;  %853 = vmatpush1.bf16.msra.mxu0 %v852_v37  ;;  %v858_v56 = vpack.c.bf16 %v332_v50, %v330_v49  ;;  %v331_v58 = vld [vmem:[%s1011_s28 + $0x90] sm:$0x7]  ;;  %v431_v59 = vld [vmem:[%s1017_s7 + $0x80] sm:$0xff] }
  0x1e   : > { %875 = vmatpush1.bf16.msra.mxu1 %v874_v41  ;;  %855 = vmatprep.subr.bf16.mxu0 %v854_v42  ;;  %v880_v60 = vpack.c.bf16 %v434_v52, %v432_v51  ;;  %v433_v61 = vld [vmem:[%s1017_s7 + $0x90] sm:$0x7]  ;;  %v513_v62 = vld [vmem:[%s1059_s10 + $0x8] sm:$0xff]  ;;  %v515_v63 = vld [vmem:[%s1059_s10 + $0x18] sm:$0xff]  ;;  %v861_v3 = vpack.c.bf16 %v331_v58, %v329_v57 }
  0x1f   : > { %877 = vmatprep.subr.bf16.mxu1 %v876_v46  ;;  %v610_v1 = vld [vmem:[%s1069_s13 + $0x8] sm:$0xff]  ;;  %v612_v2 = vld [vmem:[%s1069_s13 + $0x18] sm:$0xff]  ;;  %v883_v4 = vpack.c.bf16 %v433_v61, %v431_v59  ;;  %v886_v5 = vpack.c.bf16 %v515_v63, %v513_v62  ;;  %v512_v6 = vld [vmem:[%s1059_s10] sm:$0xff] }
  0x20   : > { %v514_v7 = vld [vmem:[%s1059_s10 + $0x10] sm:$0xff]  ;;  %v609_v8 = vld [vmem:[%s1069_s13] sm:$0xff]  ;;  %v908_v9 = vpack.c.bf16 %v612_v2, %v610_v1  ;;  %v517_v11 = vld [vmem:[%s1059_s10 + $0x28] sm:$0xff] }
  0x21   : > { %857 = vmatpush1.bf16.msra.mxu0 %v856_v53  ;;  %v611_v10 = vld [vmem:[%s1069_s13 + $0x10] sm:$0xff]  ;;  %v519_v12 = vld [vmem:[%s1059_s10 + $0x38] sm:$0xff]  ;;  %v614_v13 = vld [vmem:[%s1069_s13 + $0x28] sm:$0xff]  ;;  %v888_v16 = vpack.c.bf16 %v514_v7, %v512_v6 }
  0x22   : > { %879 = vmatpush1.bf16.msra.mxu1 %v878_v55  ;;  %860 = vmatprep.subr.msk.bf16.mxu0 %vm1061_vm2, %v858_v56  ;;  %v616_v14 = vld [vmem:[%s1069_s13 + $0x38] sm:$0xff]  ;;  %v1096_v15 = vld [vmem:[%s1157_s4] sm:$0x3f]  ;;  %v910_v17 = vpack.c.bf16 %v611_v10, %v609_v8  ;;  %v890_v18 = vpack.c.bf16 %v519_v12, %v517_v11  ;;  %v518_v20 = vld [vmem:[%s1059_s10 + $0x30] sm:$0xff] }
  0x23   : > { %882 = vmatprep.subr.msk.bf16.mxu1 %vm1061_vm2, %v880_v60  ;;  %v516_v19 = vld [vmem:[%s1059_s10 + $0x20] sm:$0xff]  ;;  %v912_v22 = vpack.c.bf16 %v616_v14, %v614_v13  ;;  %v615_v23 = vld [vmem:[%s1069_s13 + $0x30] sm:$0xff]  ;;  %v521_v24 = vld [vmem:[%s1059_s10 + $0x48] sm:$0xff] }
  0x24   : > { %v613_v21 = vld [vmem:[%s1069_s13 + $0x20] sm:$0xff]  ;;  %v523_v25 = vld [vmem:[%s1059_s10 + $0x58] sm:$0xff]  ;;  %v618_v26 = vld [vmem:[%s1069_s13 + $0x48] sm:$0xff]  ;;  %v892_v28 = vpack.c.bf16 %v518_v20, %v516_v19 }
  0x25   : > { %863 = vmatpush1.bf16.msk.msra.mxu0 %vm1061_vm2, %v861_v3  ;;  %v620_v27 = vld [vmem:[%s1069_s13 + $0x58] sm:$0xff]  ;;  %v914_v29 = vpack.c.bf16 %v615_v23, %v613_v21  ;;  %v894_v30 = vpack.c.bf16 %v523_v25, %v521_v24  ;;  %v520_v31 = vld [vmem:[%s1059_s10 + $0x40] sm:$0xff]  ;;  %v522_v32 = vld [vmem:[%s1059_s10 + $0x50] sm:$0xff] }
  0x26   : > { %885 = vmatpush1.bf16.msk.msra.mxu1 %vm1061_vm2, %v883_v4  ;;  %887 = vmatprep.subr.bf16.mxu0 %v886_v5  ;;  %v617_v33 = vld [vmem:[%s1069_s13 + $0x40] sm:$0xff]  ;;  %v916_v34 = vpack.c.bf16 %v620_v27, %v618_v26  ;;  %v619_v35 = vld [vmem:[%s1069_s13 + $0x50] sm:$0xff]  ;;  %v525_v36 = vld [vmem:[%s1059_s10 + $0x68] sm:$0xff]  ;;  %v896_v40 = vpack.c.bf16 %v522_v32, %v520_v31 }
  0x27   : > { %909 = vmatprep.subr.bf16.mxu1 %v908_v9  ;;  %v527_v37 = vld [vmem:[%s1059_s10 + $0x78] sm:$0xff]  ;;  %v622_v38 = vld [vmem:[%s1069_s13 + $0x68] sm:$0xff]  ;;  %v918_v41 = vpack.c.bf16 %v619_v35, %v617_v33  ;;  %v524_v43 = vld [vmem:[%s1059_s10 + $0x60] sm:$0xff] }
  0x28   : > { %829 = vmatmul.mubr.msk.f32.vlgmr.msra.gmra.mrb[0].mxu0 %vm333_vm3, %v1096_v15  ;;  %v624_v39 = vld [vmem:[%s1069_s13 + $0x78] sm:$0xff]  ;;  %v898_v42 = vpack.c.bf16 %v527_v37, %v525_v36  ;;  %v526_v44 = vld [vmem:[%s1059_s10 + $0x70] sm:$0xff]  ;;  %v621_v45 = vld [vmem:[%s1069_s13 + $0x60] sm:$0xff] }
  0x29   : > { %832 = vmatmul.mubr.msk.f32.vlgmr.msra.gmra.mrb[0].mxu1 %vm333_vm3, %v1096_v15  ;;  %889 = vmatpush1.bf16.msra.mxu0 %v888_v16  ;;  %v920_v46 = vpack.c.bf16 %v624_v39, %v622_v38  ;;  %v623_v47 = vld [vmem:[%s1069_s13 + $0x70] sm:$0xff]  ;;  %v529_v48 = vld [vmem:[%s1059_s10 + $0x88] sm:$0xff]  ;;  %v531_v49 = vld [vmem:[%s1059_s10 + $0x98] sm:$0x7]  ;;  %v900_v51 = vpack.c.bf16 %v526_v44, %v524_v43 }
  0x2a   : > { %911 = vmatpush1.bf16.msra.mxu1 %v910_v17  ;;  %891 = vmatprep.subr.bf16.mxu0 %v890_v18  ;;  %v628_v50 = vld [vmem:[%s1069_s13 + $0x98] sm:$0x7]  ;;  %v922_v52 = vpack.c.bf16 %v623_v47, %v621_v45  ;;  %v902_v53 = vpack.c.bf16 %v531_v49, %v529_v48  ;;  %v528_v55 = vld [vmem:[%s1059_s10 + $0x80] sm:$0xff]  ;;  %v530_v56 = vld [vmem:[%s1059_s10 + $0x90] sm:$0x7] }
  0x2b   : > { %913 = vmatprep.subr.bf16.mxu1 %v912_v22  ;;  %602 = vmatprep.mubr.f32.mxu0 %v951_v0  ;;  %v625_v58 = vld [vmem:[%s1069_s13 + $0x80] sm:$0xff]  ;;  %v627_v59 = vld [vmem:[%s1069_s13 + $0x90] sm:$0x7]  ;;  %v905_v60 = vpack.c.bf16 %v530_v56, %v528_v55 }
  0x2c   : > { %699 = vmatprep.mubr.f32.mxu1 %v951_v0  ;;  %v626_v0 = vld [vmem:[%s1069_s13 + $0x88] sm:$0xff]  ;;  %v927_v61 = vpack.c.bf16 %v627_v59, %v625_v58 }
  0x2d   : > { %893 = vmatpush1.bf16.msra.mxu0 %v892_v28  ;;  %v924_v57 = vpack.c.bf16 %v628_v50, %v626_v0 }
  0x2e   : > { %915 = vmatpush1.bf16.msra.mxu1 %v914_v29  ;;  %895 = vmatprep.subr.bf16.mxu0 %v894_v30 }
  0x2f   : > { %917 = vmatprep.subr.bf16.mxu1 %v916_v34 }
  0x31   : > { %897 = vmatpush1.bf16.msra.mxu0 %v896_v40 }
  0x32   : > { %919 = vmatpush1.bf16.msra.mxu1 %v918_v41  ;;  %899 = vmatprep.subr.bf16.mxu0 %v898_v42 }
  0x33   : > { %921 = vmatprep.subr.bf16.mxu1 %v920_v46 }
  0x35   : > { %901 = vmatpush1.bf16.msra.mxu0 %v900_v51 }
  0x36   : > { %923 = vmatpush1.bf16.msra.mxu1 %v922_v52  ;;  %904 = vmatprep.subr.msk.bf16.mxu0 %vm1061_vm2, %v902_v53 }
  0x37   : > { %926 = vmatprep.subr.msk.bf16.mxu1 %vm1061_vm2, %v924_v57 }
  0x39   : > { %907 = vmatpush1.bf16.msk.msra.mxu0 %vm1061_vm2, %v905_v60 }
  0x3a   : > { %929 = vmatpush1.bf16.msk.msra.mxu1 %vm1061_vm2, %v927_v61 }
  0x3c   : > { %835 = vmatmul.mubr.msk.f32.vlgmr.msra.gmra.mrb[2].mxu0 %vm333_vm3, %v1096_v15 }
  0x3d   : > { %838 = vmatmul.mubr.msk.f32.vlgmr.msra.gmra.mrb[2].mxu1 %vm333_vm3, %v1096_v15 }
  0x87   : > { %v716_v10 = vpop.permute.xlu0 %715 }
  0xfb   : > { %v410_v62 = vpop.f32.mrb[0].mxu0 }
  0xfc   : > { %v507_v63 = vpop.f32.mrb[0].mxu1  ;;  %v412_v1 = vpop.f32.mrb[1].mxu0 }
  0xfd   : > { %v706_v2 = vmax.f32 %v410_v62, %v507_v63  ;;  %v509_v3 = vpop.f32.mrb[1].mxu1 }
  0xfe   : > { %v707_v4 = vmax.f32 %v412_v1, %v509_v3 }
 0x10f   : > { %v604_v5 = vpop.f32.mrb[2].mxu0 }
 0x110   : > { %v701_v6 = vpop.f32.mrb[2].mxu1  ;;  %v606_v7 = vpop.f32.mrb[3].mxu0 }
 0x111   : > { %v708_v8 = vmax.f32 %v604_v5, %v701_v6  ;;  %v703_v9 = vpop.f32.mrb[3].mxu1 }
 0x112   : > { %v709_v54 = vmax.f32 %v606_v7, %v703_v9 }
 0x113   : > { %v710_v11 = vmax.f32 %v706_v2, %v708_v8 }
 0x114   : > { %v711_v12 = vmax.f32 %v707_v4, %v709_v54 }
 0x115   : > { %v718_v13 = vadd.f32 %v716_v10, %v710_v11 }
 0x116   : > { %v719_v14 = vadd.f32 %v716_v10, %v711_v12 }
 0x117   : > { %v720_v15 = vmax.f32 %v718_v13, 0.0 }
 0x118   : > { %v721_v16 = vmax.f32 %v719_v14, 0.0 }
 0x119   : > { %722 = vst [vmem:[%s311_s19] sm:$0x3f] %v720_v15 }
 0x11a   : > { %724 = vst.msk [vmem:[%s311_s19 + $0x8] sm:$0x3f] %vm723_vm4, %v721_v16 }
 0x11b PF: > { %s16_s21 = sadd.s32 1, %s949_s21  }
 0x11c   : > { %p13_p4 = scmp.ge.s32.totalorder %s16_s21, 4  }
 0x11e   :  { %15 = sbr.rel (!%p13_p4) target bundleno = 1 (0x1), region = 83 }

// kernel: net_forward.3
= control target key start
LH: loop header
LB: loop body
LE: loop exit
PB: predicated region body
PF: predicated region fallthrough
CT: control target
= control target key end

     0   :  { %s5212_s0 = inlined_call_operand.vmem [shape: f32[2,150,25], index: 0, kind: input, shape index: {}]   ;;  %s5213_s1 = inlined_call_operand.vmem [shape: f32[2,150,25], index: 1, kind: input, shape index: {}]   ;;  %s5214_s2 = inlined_call_operand.vmem [shape: f32[2,150,25], index: 2, kind: input, shape index: {}]   ;;  %s5215_s3 = inlined_call_operand.vmem [shape: f32[2,150,25], index: 3, kind: input, shape index: {}]   ;;  %s5216_s4 = inlined_call_operand.vmem [shape: f32[2,1,10], index: 4, kind: input, shape index: {}]   ;;  %s5217_s5 = inlined_call_operand.vmem [shape: f32[16,150], index: 5, kind: input, shape index: {}]   ;;  %s5218_s6 = inlined_call_operand.vmem [shape: f32[16,1], index: 6, kind: input, shape index: {}]   ;;  %s5219_s7 = inlined_call_operand.vmem [shape: f32[400,120], index: 7, kind: input, shape index: {}]   ;;  %s5220_s8 = inlined_call_operand.vmem [shape: f32[1,120], index: 8, kind: input, shape index: {}]   ;;  %s5221_s9 = inlined_call_operand.vmem [shape: f32[120,84], index: 9, kind: input, shape index: {}]   ;;  %s5222_s10 = inlined_call_operand.vmem [shape: f32[1,84], index: 10, kind: input, shape index: {}]   ;;  %s5223_s11 = inlined_call_operand.vmem [shape: f32[84,9], index: 11, kind: input, shape index: {}]   ;;  %s5224_s12 = inlined_call_operand.vmem [shape: f32[1,9], index: 12, kind: input, shape index: {}]   ;;  %s5225_s13 = inlined_call_operand.vmem [shape: f32[10,128], index: 13, kind: input, shape index: {}]   ;;  %s5226_s14 = inlined_call_operand.vmem [shape: f32[1,128], index: 14, kind: input, shape index: {}]   ;;  %s5227_s15 = inlined_call_operand.vmem [shape: f32[128,256], index: 15, kind: input, shape index: {}]   ;;  %s5228_s16 = inlined_call_operand.vmem [shape: f32[1,256], index: 16, kind: input, shape index: {}]   ;;  %s5229_s17 = inlined_call_operand.vmem [shape: f32[256,9], index: 17, kind: input, shape index: {}]   ;;  %s5230_s18 = inlined_call_operand.vmem [shape: f32[1,9], index: 18, kind: input, shape index: {}]   ;;  %s5231_s19 = inlined_call_operand.vmem [shape: f32[18,9], index: 19, kind: input, shape index: {}]   ;;  %s5232_s20 = inlined_call_operand.vmem [shape: f32[1,9], index: 20, kind: input, shape index: {}]   ;;  %s5233_s21 = inlined_call_operand.hbm [shape: f32[2,1,9], index: 21, kind: output, shape index: {}]  }
   0x1   :  { %5242 = sst [smem:[#allocation11_spill]] %s5212_s0 }
   0x2   :  { %5243 = sst [smem:[#allocation12_spill]] %s5213_s1 }
   0x3   :  { %5244 = sst [smem:[#allocation13_spill]] %s5214_s2 }
   0x4   :  { %5245 = sst [smem:[#allocation14_spill]] %s5215_s3 }
   0x5   :  { %5246 = sst [smem:[#allocation15_spill]] %s5216_s4 }
   0x6   :  { %5247 = sst [smem:[#allocation16_spill]] %s5217_s5 }
   0x7   :  { %5248 = sst [smem:[#allocation17_spill]] %s5218_s6 }
   0x8   :  { %5249 = sst [smem:[#allocation18_spill]] %s5233_s21 }
   0x9   :  { %26 = vsyncpa [#allocation3], 0 }
   0xa   :  { %28 = vsyncpa [#allocation3 + $0x1], 0  ;;  %s4236_s2 = smov 0   ;;  %s4238_s25 = smov 0  }
   0xb   :  { %s4240_s26 = smov 0   ;;  %s4242_s27 = smov 0  }
   0xc LB: > { %5250 = sst [smem:[#allocation5_spill]] %s4106_s2  ;;  %s4257_s3 = sadd.s32 4294967295, %s4118_s27   ;;  %s4118_s27 = sphi %s4242_s27, %s5271_s27   ;;  %s4114_s26 = sphi %s4240_s26, %s5273_s26   ;;  %s4110_s25 = sphi %s4238_s25, %s5275_s25   ;;  %s4106_s2 = sphi %s4236_s2, %s5274_s2  }
   0xd   : > { %5251 = sst [smem:[#allocation6_spill]] %s4114_s26  ;;  %s3207_s28 = sadd.s32 4294967294, %s4118_s27  }
   0xe   : > { %5252 = sst [smem:[#allocation7_spill]] %s4118_s27  ;;  %s4261_s29 = sadd.s32 1, %s4118_s27  }
   0xf   : > { %5253 = sst [smem:[#allocation8_spill]] %s4261_s29  ;;  %s507_s0 = sadd.s32 1, %s4114_s26 }
  0x10   : > { %s504_s4 = ssub.s32 %s4118_s27, %s4261_s29  ;;  %p517_p0 = scmp.ne.s32.totalorder %s4114_s26, %s4110_s25 }
  0x11   : > { %p505_p1 = scmp.eq.s32.totalorder %s504_s4, 0  ;;  %p518_p2 = scmp.eq.s32.totalorder %s4257_s3, 1 }
  0x12   : > { %p523_p3 = scmp.ne.s32.totalorder %s4110_s25, %s4106_s2  ;;  %p524_p4 = scmp.eq.s32.totalorder %s3207_s28, 1 }
  0x13   : > { %s4272_s30 = scalar_select %p505_p1, %s4114_s26, %s507_s0  }
  0x14   : > { %p4274_p5 = por %p518_p2, %p517_p0  ;;  %p4278_p6 = por %p524_p4, %p523_p3 }
  0x15   : > { %5254 = sst [smem:[#allocation9_spill]] %s4272_s30  ;;  %p3210_p7 = scmp.ge.s32.totalorder %s4118_s27, 1 }
  0x16   : > { %s5256_s22 = scalar_select %p4278_p6, 1, 0 }
  0x17   : > { %p628_p8 = scmp.lt.s32.totalorder %s4118_s27, 3 }
  0x18   : > { %5257 = sst [smem:[#allocation10_spill]] %s5256_s22 }
  0x19   : > { %p629_p9 = pnand %p3210_p7, %p628_p8 }
  0x1a   : > { %p705_p10 = scmp.lt.s32.totalorder (!%p629_p9), %s4257_s3, 1  ;;  %s5258_s24 = sld [smem:[#allocation16_spill]] (!%p629_p9)  ;;  %vm751_vm0 = vcmask (!%p629_p9), 179200   ;;  %v4120_v1 = vmov (!%p629_p9), 0.0|0.0   ;;  %v4121_v3 = vmov (!%p629_p9), 0   ;;  %v4122_v61 = vmov (!%p629_p9), 0.0  }
  0x1b   : > { %632 = sbr.rel (%p629_p9) target bundleno = 1718 (0x6b6), region = 104  ;;  %3678 = vmatprep.subr.bf16.mxu0 (!%p629_p9), %v4120_v1  ;;  %3705 = vmatprep.subr.bf16.mxu1 (!%p629_p9), %v4120_v1  ;;  %s5259_s6 = sld [smem:[#allocation17_spill]] (!%p629_p9)  ;;  %vm758_vm1 = vcmask (!%p629_p9), 1045504   ;;  %vm1163_vm2 = vcmask (!%p629_p9), 1040384   ;;  %vm4123_vm3 = vmmov (!%p629_p9), 1   ;;  %vm4124_vm5 = vmmov (!%p629_p9), 0  }
  0x1c   : > { %4055 = vset.pattern.permute.xlu0 (!%p629_p9), %v4121_v3  ;;  %s5260_s22 = sld [smem:[#allocation11_spill]] (!%p629_p9)  ;;  %s5261_s0 = sld [smem:[#allocation12_spill]] (!%p629_p9)  ;;  %vm4507_vm4 = vmpackc.low (!%p629_p9), %vm1163_vm2, %vm4123_vm3  ;;  %vm1160_vm6 = vcmask (!%p629_p9), 203776   ;;  %vm2465_vm7 = vcmask (!%p629_p9), 982016   ;;  %vm2556_vm8 = vcmask (!%p629_p9), 1043456   ;;  %vm2638_vm9 = vcmask (!%p629_p9), 1041408  }
  0x1d   : > { %s5262_s27 = sld [smem:[#allocation13_spill]] (!%p629_p9)  ;;  %s5263_s1 = sld [smem:[#allocation14_spill]] (!%p629_p9)  ;;  %vm2552_vm10 = vcmask (!%p629_p9), 687104   ;;  %vm3936_vm11 = vmpackc.low (!%p629_p9), %vm2638_vm9, %vm4123_vm3  ;;  %vm2634_vm12 = vcmask (!%p629_p9), 80896   ;;  %vm2937_vm13 = vcmask (!%p629_p9), 72704   ;;  %vm3092_vm14 = vcmask (!%p629_p9), 65536  }
  0x1e   : > { %s703_s21 = sand.u32 (!%p629_p9), 1, %s4110_s25   ;;  %s3268_s26 = sshll.u32 (!%p629_p9), %s4257_s3, 4 }
  0x20   : > { %v4288_v0 = vld [vmem:[%s5258_s24 + $0x8] sm:$0xff] (!%p629_p9) }
  0x21   : > { %3216 = vmatprep.mubr.msk.f32.mxu0 (!%p629_p9), %vm751_vm0, %v4288_v0  ;;  %3219 = vmatprep.mubr.msk.f32.mxu1 (!%p629_p9), %vm751_vm0, %v4288_v0  ;;  %v1134_v2 = vld [vmem:[%s5259_s6] sm:$0xff] (!%p629_p9)  ;;  %v1135_v4 = vld [vmem:[%s5259_s6 + $0x8] sm:$0xff] (!%p629_p9) }
  0x22   : > { %s4293_s28 = scalar_select %p705_p10, %s4257_s3, 1  ;;  %1138 = vperm.xlu0 %4055, %v1134_v2  }
  0x23   : > { %s4125_s3 = smov [#allocation2]  }
  0x24   : > { %s4303_s23 = smul.u32 152, %s4293_s28 }
  0x26   : > { %s4312_s2 = scalar_lea.vmem %s5260_s22, %s4303_s23  ;;  %s4318_s4 = scalar_lea.vmem %s5261_s0, %s4303_s23  ;;  %1143 = vperm.xlu0 %4055, %v1135_v4   ;;  %v4395_v4 = vld [vmem:[%s5258_s24] sm:$0xff] }
  0x27   : > { %v732_v5 = vld [vmem:[%s4312_s2] sm:$0xff]  ;;  %v733_v6 = vld [vmem:[%s4312_s2 + $0x8] sm:$0xff]  ;;  %v734_v10 = vld [vmem:[%s4312_s2 + $0x10] sm:$0xff]  ;;  %s4375_s29 = scalar_lea.vmem %s5262_s27, %s4303_s23  ;;  %s4382_s0 = scalar_lea.vmem %s5263_s1, %s4303_s23 }
  0x28   : > { %v837_v7 = vld [vmem:[%s4318_s4] sm:$0xff]  ;;  %v3679_v8 = vpack.c.bf16 %v733_v6, %v732_v5  ;;  %v838_v9 = vld [vmem:[%s4318_s4 + $0x8] sm:$0xff]  ;;  %v735_v11 = vld [vmem:[%s4312_s2 + $0x18] sm:$0xff]  ;;  %s704_s27 = scalar_lea.vmem [#allocation2], %s703_s21  ;;  %s5267_s22 = sld [smem:[#allocation18_spill]] }
  0x29   : > { %v3706_v12 = vpack.c.bf16 %v838_v9, %v837_v7  ;;  %v839_v13 = vld [vmem:[%s4318_s4 + $0x10] sm:$0xff]  ;;  %v840_v14 = vld [vmem:[%s4318_s4 + $0x18] sm:$0xff]  ;;  %v3682_v15 = vpack.c.bf16 %v735_v11, %v734_v10  ;;  %v736_v17 = vld [vmem:[%s4312_s2 + $0x20] sm:$0xff]  ;;  %s4060_s23 = sshll.u32 %s4125_s3, 4  ;;  %s4061_s23 = int_to_ptr.vmem [resolvable:$false] %s4060_s23 }
  0x2a   : > { %3680 = vmatpush1.bf16.msra.mxu0 %v3679_v8  ;;  %v3709_v16 = vpack.c.bf16 %v840_v14, %v839_v13  ;;  %v737_v18 = vld [vmem:[%s4312_s2 + $0x28] sm:$0xff]  ;;  %v841_v19 = vld [vmem:[%s4318_s4 + $0x20] sm:$0xff]  ;;  %v738_v23 = vld [vmem:[%s4312_s2 + $0x30] sm:$0xff] }
  0x2b   : > { %3707 = vmatpush1.bf16.msra.mxu1 %v3706_v12  ;;  %3681 = vmatprep.subr.bf16.mxu0 %v4120_v1  ;;  %v842_v20 = vld [vmem:[%s4318_s4 + $0x28] sm:$0xff]  ;;  %v3685_v21 = vpack.c.bf16 %v737_v18, %v736_v17  ;;  %v739_v24 = vld [vmem:[%s4312_s2 + $0x38] sm:$0xff]  ;;  %v843_v25 = vld [vmem:[%s4318_s4 + $0x30] sm:$0xff] }
  0x2c   : > { %3708 = vmatprep.subr.bf16.mxu1 %v4120_v1  ;;  %v3712_v22 = vpack.c.bf16 %v842_v20, %v841_v19  ;;  %v844_v26 = vld [vmem:[%s4318_s4 + $0x38] sm:$0xff]  ;;  %v3688_v27 = vpack.c.bf16 %v739_v24, %v738_v23  ;;  %v740_v29 = vld [vmem:[%s4312_s2 + $0x40] sm:$0xff]  ;;  %v741_v30 = vld [vmem:[%s4312_s2 + $0x48] sm:$0xff] }
  0x2d   : > { %v3715_v28 = vpack.c.bf16 %v844_v26, %v843_v25  ;;  %v845_v31 = vld [vmem:[%s4318_s4 + $0x40] sm:$0xff]  ;;  %v846_v32 = vld [vmem:[%s4318_s4 + $0x48] sm:$0xff]  ;;  %v3691_v33 = vpack.c.bf16 %v741_v30, %v740_v29  ;;  %v742_v35 = vld [vmem:[%s4312_s2 + $0x50] sm:$0xff] }
  0x2e   : > { %3683 = vmatpush1.bf16.msra.mxu0 %v3682_v15  ;;  %v3718_v34 = vpack.c.bf16 %v846_v32, %v845_v31  ;;  %v743_v36 = vld [vmem:[%s4312_s2 + $0x58] sm:$0xff]  ;;  %v847_v37 = vld [vmem:[%s4318_s4 + $0x50] sm:$0xff]  ;;  %v744_v41 = vld [vmem:[%s4312_s2 + $0x60] sm:$0xff]  ;;  %s5170_s1 = scalar_lea.hbm %s5267_s22, %s3268_s26 }
  0x2f   : > { %3710 = vmatpush1.bf16.msra.mxu1 %v3709_v16  ;;  %3684 = vmatprep.subr.bf16.mxu0 %v4120_v1  ;;  %v848_v38 = vld [vmem:[%s4318_s4 + $0x58] sm:$0xff]  ;;  %v3694_v39 = vpack.c.bf16 %v743_v36, %v742_v35  ;;  %v745_v42 = vld [vmem:[%s4312_s2 + $0x68] sm:$0xff]  ;;  %v849_v43 = vld [vmem:[%s4318_s4 + $0x60] sm:$0xff] }
  0x30   : > { %3711 = vmatprep.subr.bf16.mxu1 %v4120_v1  ;;  %v3721_v40 = vpack.c.bf16 %v848_v38, %v847_v37  ;;  %v850_v44 = vld [vmem:[%s4318_s4 + $0x68] sm:$0xff]  ;;  %v3697_v45 = vpack.c.bf16 %v745_v42, %v744_v41  ;;  %v746_v47 = vld [vmem:[%s4312_s2 + $0x70] sm:$0xff]  ;;  %v747_v48 = vld [vmem:[%s4312_s2 + $0x78] sm:$0xff] }
  0x31   : > { %v3724_v46 = vpack.c.bf16 %v850_v44, %v849_v43  ;;  %v851_v49 = vld [vmem:[%s4318_s4 + $0x70] sm:$0xff]  ;;  %v852_v50 = vld [vmem:[%s4318_s4 + $0x78] sm:$0xff]  ;;  %v3700_v51 = vpack.c.bf16 %v747_v48, %v746_v47  ;;  %v748_v53 = vld [vmem:[%s4312_s2 + $0x80] sm:$0xff] }
  0x32   : > { %3686 = vmatpush1.bf16.msra.mxu0 %v3685_v21  ;;  %v3727_v52 = vpack.c.bf16 %v852_v50, %v851_v49  ;;  %v749_v54 = vld [vmem:[%s4312_s2 + $0x88] sm:$0xff]  ;;  %v853_v55 = vld [vmem:[%s4318_s4 + $0x80] sm:$0xff]  ;;  %v750_v62 = vld [vmem:[%s4312_s2 + $0x90] sm:$0x3f]  ;;  %s5266_s2 = sld [smem:[#allocation15_spill]] }
  0x33   : > { %3713 = vmatpush1.bf16.msra.mxu1 %v3712_v22  ;;  %3687 = vmatprep.subr.bf16.mxu0 %v4120_v1  ;;  %v854_v56 = vld [vmem:[%s4318_s4 + $0x88] sm:$0xff]  ;;  %v3703_v57 = vpack.c.bf16 %v749_v54, %v748_v53  ;;  %v934_v59 = vld [vmem:[%s4375_s29] sm:$0xff]  ;;  %v855_v3 = vld [vmem:[%s4318_s4 + $0x90] sm:$0x3f] }
  0x34   : > { %3714 = vmatprep.subr.bf16.mxu1 %v4120_v1  ;;  %v3730_v58 = vpack.c.bf16 %v854_v56, %v853_v55  ;;  %v935_v60 = vld [vmem:[%s4375_s29 + $0x8] sm:$0xff]  ;;  %v1031_v63 = vld [vmem:[%s4382_s0] sm:$0xff]  ;;  %v936_v7 = vld [vmem:[%s4375_s29 + $0x10] sm:$0xff] }
  0x35   : > { %v1032_v2 = vld [vmem:[%s4382_s0 + $0x8] sm:$0xff]  ;;  %v3733_v5 = vpack.c.bf16 %v935_v60, %v934_v59  ;;  %v937_v8 = vld [vmem:[%s4375_s29 + $0x18] sm:$0xff]  ;;  %v1033_v9 = vld [vmem:[%s4382_s0 + $0x10] sm:$0xff] }
  0x36   : > { %3689 = vmatpush1.bf16.msra.mxu0 %v3688_v27  ;;  %v3760_v6 = vpack.c.bf16 %v1032_v2, %v1031_v63  ;;  %v1034_v10 = vld [vmem:[%s4382_s0 + $0x18] sm:$0xff]  ;;  %v3736_v12 = vpack.c.bf16 %v937_v8, %v936_v7  ;;  %v4415_v13 = vld [vmem:[%s5258_s24 + $0x10] sm:$0xff]  ;;  %v938_v15 = vld [vmem:[%s4375_s29 + $0x20] sm:$0xff] }
  0x37   : > { %3716 = vmatpush1.bf16.msra.mxu1 %v3715_v28  ;;  %3690 = vmatprep.subr.bf16.mxu0 %v4120_v1  ;;  %v4409_v11 = vld [vmem:[%s5258_s24 + $0x18] sm:$0xff]  ;;  %v3763_v14 = vpack.c.bf16 %v1034_v10, %v1033_v9  ;;  %v939_v16 = vld [vmem:[%s4375_s29 + $0x28] sm:$0xff]  ;;  %v1035_v17 = vld [vmem:[%s4382_s0 + $0x20] sm:$0xff] }
  0x38   : > { %3717 = vmatprep.subr.bf16.mxu1 %v4120_v1  ;;  %v1036_v18 = vld [vmem:[%s4382_s0 + $0x28] sm:$0xff]  ;;  %v3739_v19 = vpack.c.bf16 %v939_v16, %v938_v15  ;;  %v940_v21 = vld [vmem:[%s4375_s29 + $0x30] sm:$0xff]  ;;  %v941_v22 = vld [vmem:[%s4375_s29 + $0x38] sm:$0xff]  ;;  %s727_s4 = scalar_lea.vmem %s5266_s2, %s4293_s28  ;;  %s4062_s2 = scalar_lea.vmem %s4061_s23, 32 }
  0x39   : > { %v3766_v20 = vpack.c.bf16 %v1036_v18, %v1035_v17  ;;  %v1037_v23 = vld [vmem:[%s4382_s0 + $0x30] sm:$0xff]  ;;  %v1038_v24 = vld [vmem:[%s4382_s0 + $0x38] sm:$0xff]  ;;  %v3742_v25 = vpack.c.bf16 %v941_v22, %v940_v21  ;;  %v942_v27 = vld [vmem:[%s4375_s29 + $0x40] sm:$0xff] }
  0x3a   : > { %3692 = vmatpush1.bf16.msra.mxu0 %v3691_v33  ;;  %v3769_v26 = vpack.c.bf16 %v1038_v24, %v1037_v23  ;;  %v943_v28 = vld [vmem:[%s4375_s29 + $0x48] sm:$0xff]  ;;  %v1039_v29 = vld [vmem:[%s4382_s0 + $0x40] sm:$0xff]  ;;  %v944_v32 = vld [vmem:[%s4375_s29 + $0x50] sm:$0xff] }
  0x3b   : > { %3719 = vmatpush1.bf16.msra.mxu1 %v3718_v34  ;;  %3693 = vmatprep.subr.bf16.mxu0 %v4120_v1  ;;  %v1040_v30 = vld [vmem:[%s4382_s0 + $0x48] sm:$0xff]  ;;  %v945_v33 = vld [vmem:[%s4375_s29 + $0x58] sm:$0xff]  ;;  %v1041_v34 = vld [vmem:[%s4382_s0 + $0x50] sm:$0xff] }
  0x3c   : > { %3720 = vmatprep.subr.bf16.mxu1 %v4120_v1  ;;  %v3772_v31 = vpack.c.bf16 %v1040_v30, %v1039_v29  ;;  %v1042_v35 = vld [vmem:[%s4382_s0 + $0x58] sm:$0xff]  ;;  %v3748_v36 = vpack.c.bf16 %v945_v33, %v944_v32  ;;  %v946_v38 = vld [vmem:[%s4375_s29 + $0x60] sm:$0xff]  ;;  %v1044_v41 = vld [vmem:[%s4382_s0 + $0x68] sm:$0xff] }
  0x3d   : > { %v3775_v37 = vpack.c.bf16 %v1042_v35, %v1041_v34  ;;  %v948_v44 = vld [vmem:[%s4375_s29 + $0x70] sm:$0xff]  ;;  %v1046_v47 = vld [vmem:[%s4382_s0 + $0x78] sm:$0xff]  ;;  %v950_v50 = vld [vmem:[%s4375_s29 + $0x80] sm:$0xff] }
  0x3e   : > { %3695 = vmatpush1.bf16.msra.mxu0 %v3694_v39  ;;  %v947_v39 = vld [vmem:[%s4375_s29 + $0x68] sm:$0xff]  ;;  %v952_v56 = vld [vmem:[%s4375_s29 + $0x90] sm:$0x3f]  ;;  %v1313_v34 = vld [vmem:[%s5219_s7 + $0x3a] sm:$0xff] }
  0x3f   : > { %3722 = vmatpush1.bf16.msra.mxu1 %v3721_v40  ;;  %3696 = vmatprep.subr.bf16.mxu0 %v4120_v1  ;;  %v1043_v40 = vld [vmem:[%s4382_s0 + $0x60] sm:$0xff]  ;;  %v3751_v42 = vpack.c.bf16 %v947_v39, %v946_v38  ;;  %v1048_v53 = vld [vmem:[%s4382_s0 + $0x88] sm:$0xff]  ;;  %v1157_v8 = vld [vmem:[%s5219_s7 + $0x31] sm:$0x1] }
  0x40   : > { %3723 = vmatprep.subr.bf16.mxu1 %v4120_v1  ;;  %v3778_v43 = vpack.c.bf16 %v1044_v41, %v1043_v40  ;;  %v1151_v59 = vld [vmem:[%s5219_s7 + $0x8] sm:$0xff]  ;;  %v1394_v29 = vld [vmem:[%s5219_s7 + $0x53] sm:$0xff]  ;;  %v1395_v39 = vld [vmem:[%s5219_s7 + $0x5b] sm:$0xff] }
  0x41   : > { %v1155_v63 = vld [vmem:[%s5219_s7 + $0x21] sm:$0xff]  ;;  %v1156_v7 = vld [vmem:[%s5219_s7 + $0x29] sm:$0xff]  ;;  %v1312_v33 = vld [vmem:[%s5219_s7 + $0x32] sm:$0xff] }
  0x42   : > { %3698 = vmatpush1.bf16.msra.mxu0 %v3697_v45  ;;  %v949_v45 = vld [vmem:[%s4375_s29 + $0x78] sm:$0xff]  ;;  %v3790_v9 = vpack.c.bf16 %v1157_v8, %v1156_v7  ;;  %v1396_v40 = vld [vmem:[%s5219_s7 + $0x63] sm:$0x1]  ;;  %v3801_v41 = vpack.c.bf16 %v1313_v34, %v1312_v33  ;;  %v1720_v8 = vld [vmem:[%s5219_s7 + $0xc7] sm:$0x1] }
  0x43   : > { %3725 = vmatpush1.bf16.msra.mxu1 %v3724_v46  ;;  %3699 = vmatprep.subr.bf16.mxu0 %v4120_v1  ;;  %v1045_v46 = vld [vmem:[%s4382_s0 + $0x70] sm:$0xff]  ;;  %v3754_v48 = vpack.c.bf16 %v949_v45, %v948_v44  ;;  %v1315_v44 = vld [vmem:[%s5219_s7 + $0x4a] sm:$0x1]  ;;  %v3811_v45 = vpack.c.bf16 %v1396_v40, %v1395_v39  ;;  %v1719_v7 = vld [vmem:[%s5219_s7 + $0xbf] sm:$0xff] }
  0x44   : > { %3726 = vmatprep.subr.bf16.mxu1 %v4120_v1  ;;  %v3781_v49 = vpack.c.bf16 %v1046_v47, %v1045_v46  ;;  %v1555_v46 = vld [vmem:[%s5219_s7 + $0x7d] sm:$0xff]  ;;  %v1556_v47 = vld [vmem:[%s5219_s7 + $0x85] sm:$0xff] }
  0x45   : > { %v1960_v33 = vld [vmem:[%s5219_s7 + $0xfa] sm:$0xff]  ;;  %v1961_v34 = vld [vmem:[%s5219_s7 + $0x102] sm:$0xff]  ;;  %v1962_v40 = vld [vmem:[%s5219_s7 + $0x10a] sm:$0xff] }
  0x46   : > { %3701 = vmatpush1.bf16.msra.mxu0 %v3700_v51  ;;  %v951_v51 = vld [vmem:[%s4375_s29 + $0x88] sm:$0xff]  ;;  %v3857_v39 = vpack.c.bf16 %v1961_v34, %v1960_v33  ;;  %v2463_v34 = vld [vmem:[%s5221_s9 + $0x70] sm:$0xff]  ;;  %s3107_s29 = sshll.u32 %s704_s27, 4  ;;  %s5172_s29 = int_to_ptr.vmem [resolvable:$true] %s3107_s29 }
  0x47   : > { %3728 = vmatpush1.bf16.msra.mxu1 %v3727_v52  ;;  %3702 = vmatprep.subr.bf16.mxu0 %v4120_v1  ;;  %v1047_v52 = vld [vmem:[%s4382_s0 + $0x80] sm:$0xff]  ;;  %v3757_v54 = vpack.c.bf16 %v951_v51, %v950_v50  ;;  %v1475_v50 = vld [vmem:[%s5219_s7 + $0x6c] sm:$0xff]  ;;  %v3822_v51 = vpack.c.bf16 %v1556_v47, %v1555_v46  ;;  %v2123_v47 = vld [vmem:[%s5219_s7 + $0x134] sm:$0xff]  ;;  %s4056_s28 = scalar_lea.vmem %s5172_s29, 16  ;;  %p4063_p0 = scmp.lt.s32.totalorder %s5172_s29, %s4061_s23 }
  0x48   : > { %3729 = vmatprep.subr.bf16.mxu1 %v4120_v1  ;;  %v3784_v55 = vpack.c.bf16 %v1048_v53, %v1047_v52  ;;  %v1557_v53 = vld [vmem:[%s5219_s7 + $0x8d] sm:$0xff]  ;;  %p4057_p11 = scmp.ne.s32.totalorder %s5172_s29, %s4056_s28  ;;  %p4064_p1 = scmp.lt.s32.totalorder %s4062_s2, %s4056_s28 }
  0x49   : > { %v2122_v46 = vld [vmem:[%s5219_s7 + $0x12c] sm:$0xff] }
  0x4a   : > { %3704 = vmatpush1.bf16.msra.mxu0 %v3703_v57  ;;  %v1049_v57 = vld [vmem:[%s4382_s0 + $0x90] sm:$0x3f]  ;;  %s3095_s0 = scalar_lea.sflag [#allocation3], %s703_s21  ;;  %p4058_p12 = pnand %p4057_p11, %p4274_p5 }
  0x4b   : > { %3731 = vmatpush1.bf16.msra.mxu1 %v3730_v58  ;;  %798 = vmatprep.subr.mxu0 %v4122_v61  ;;  %v1150_v58 = vld [vmem:[%s5219_s7] sm:$0xff]  ;;  %p4065_p2 = por %p4064_p1, %p4063_p0 }
  0x4c   : > { %895 = vmatprep.subr.mxu1 %v4122_v61  ;;  %v3794_v60 = vpack.c.bf16 %v1151_v59, %v1150_v58  ;;  %v1477_v58 = vld [vmem:[%s5219_s7 + $0x7c] sm:$0x1]  ;;  %p4059_p13 = pneg %p4058_p12 }
  0x4e   : > { %3215 = vmatpush1.msk.msra.mxu0 %vm758_vm1, %v750_v62  ;;  %v1154_v62 = vld [vmem:[%s5219_s7 + $0x19] sm:$0xff]  ;;  %p4066_p3 = pnand %p4065_p2, %p4059_p13 }
  0x4f   : > { %3218 = vmatpush1.msk.msra.mxu1 %vm758_vm1, %v855_v3  ;;  %827 = vmatmul.mubr.f32.vlgmr.msra.gmra.mrb[0].mxu0 %v4395_v4  ;;  %v3787_v2 = vpack.c.bf16 %v1155_v63, %v1154_v62  ;;  %v1152_v3 = vld [vmem:[%s5219_s7 + $0x10] sm:$0xff] }
  0x50   : > { %924 = vmatmul.mubr.f32.vlgmr.msra.gmra.mrb[0].mxu1 %v4395_v4  ;;  %3732 = vmatprep.subr.bf16.mxu0 %v4120_v1  ;;  %v1718_v62 = vld [vmem:[%s5219_s7 + $0xb7] sm:$0xff] }
  0x51   : > { %3759 = vmatprep.subr.bf16.mxu1 %v4120_v1  ;;  %3734 = vmatpush1.bf16.msra.mxu0 %v3733_v5 }
  0x52   : > { %3761 = vmatpush1.bf16.msra.mxu1 %v3760_v6  ;;  %3735 = vmatprep.subr.bf16.mxu0 %v4120_v1 }
  0x53   : > { %3762 = vmatprep.subr.bf16.mxu1 %v4120_v1  ;;  %3217 = vmatprep.mubr.msk.f32.mxu0 %vm751_vm0, %v4409_v11 }
  0x54   : > { %3220 = vmatprep.mubr.msk.f32.mxu1 %vm751_vm0, %v4409_v11  ;;  %832 = vmatmul.mubr.f32.gmra.mrb[2].mxu0 %v4415_v13 }
  0x55   : > { %3737 = vmatpush1.bf16.msra.mxu0 %v3736_v12  ;;  %929 = vmatmul.mubr.f32.gmra.mrb[2].mxu1 %v4415_v13 }
  0x56   : > { %3764 = vmatpush1.bf16.msra.mxu1 %v3763_v14  ;;  %3738 = vmatprep.subr.bf16.mxu0 %v4120_v1 }
  0x57   : > { %3765 = vmatprep.subr.bf16.mxu1 %v4120_v1  ;;  %3222 = vmatprep.mubr.msk.f32.mxu0 %vm751_vm0, %v4288_v0 }
  0x58   : > { %3225 = vmatprep.mubr.msk.f32.mxu1 %vm751_vm0, %v4288_v0  ;;  %v3745_v0 = vpack.c.bf16 %v943_v28, %v942_v27  ;;  %v1393_v28 = vld [vmem:[%s5219_s7 + $0x4b] sm:$0xff] }
  0x59   : > { %3740 = vmatpush1.bf16.msra.mxu0 %v3739_v19 }
  0x5a   : > { %3767 = vmatpush1.bf16.msra.mxu1 %v3766_v20  ;;  %3741 = vmatprep.subr.bf16.mxu0 %v4120_v1 }
  0x5b   : > { %3768 = vmatprep.subr.bf16.mxu1 %v4120_v1 }
  0x5d   : > { %3743 = vmatpush1.bf16.msra.mxu0 %v3742_v25 }
  0x5e   : > { %3770 = vmatpush1.bf16.msra.mxu1 %v3769_v26  ;;  %3744 = vmatprep.subr.bf16.mxu0 %v4120_v1 }
  0x5f   : > { %3771 = vmatprep.subr.bf16.mxu1 %v4120_v1 }
  0x61   : > { %3746 = vmatpush1.bf16.msra.mxu0 %v3745_v0 }
  0x62   : > { %3773 = vmatpush1.bf16.msra.mxu1 %v3772_v31  ;;  %3747 = vmatprep.subr.bf16.mxu0 %v4120_v1 }
  0x63   : > { %3774 = vmatprep.subr.bf16.mxu1 %v4120_v1 }
  0x65   : > { %3749 = vmatpush1.bf16.msra.mxu0 %v3748_v36  ;;  %v3808_v36 = vpack.c.bf16 %v1394_v29, %v1393_v28  ;;  %v1801_v28 = vld [vmem:[%s5219_s7 + $0xe0] sm:$0x1] }
  0x66   : > { %3776 = vmatpush1.bf16.msra.mxu1 %v3775_v37  ;;  %3750 = vmatprep.subr.bf16.mxu0 %v4120_v1 }
  0x67   : > { %3777 = vmatprep.subr.bf16.mxu1 %v4120_v1 }
  0x69   : > { %3752 = vmatpush1.bf16.msra.mxu0 %v3751_v42 }
  0x6a   : > { %3779 = vmatpush1.bf16.msra.mxu1 %v3778_v43  ;;  %3753 = vmatprep.subr.bf16.mxu0 %v4120_v1  ;;  %v1314_v43 = vld [vmem:[%s5219_s7 + $0x42] sm:$0xff] }
  0x6b   : > { %3780 = vmatprep.subr.bf16.mxu1 %v4120_v1 }
  0x6d   : > { %3755 = vmatpush1.bf16.msra.mxu0 %v3754_v48  ;;  %v3804_v48 = vpack.c.bf16 %v1315_v44, %v1314_v43  ;;  %v2203_v43 = vld [vmem:[%s5219_s7 + $0x145] sm:$0xff]  ;;  %v2204_v44 = vld [vmem:[%s5219_s7 + $0x14d] sm:$0xff] }
  0x6e   : > { %3782 = vmatpush1.bf16.msra.mxu1 %v3781_v49  ;;  %3756 = vmatprep.subr.bf16.mxu0 %v4120_v1  ;;  %v1474_v49 = vld [vmem:[%s5219_s7 + $0x64] sm:$0xff] }
  0x6f   : > { %3783 = vmatprep.subr.bf16.mxu1 %v4120_v1 }
  0x71   : > { %3758 = vmatpush1.bf16.msra.mxu0 %v3757_v54  ;;  %v1558_v54 = vld [vmem:[%s5219_s7 + $0x95] sm:$0x1] }
  0x72   : > { %3785 = vmatpush1.bf16.msra.mxu1 %v3784_v55  ;;  %992 = vmatprep.subr.mxu0 %v4122_v61  ;;  %v3815_v55 = vpack.c.bf16 %v1475_v50, %v1474_v49  ;;  %v3825_v59 = vpack.c.bf16 %v1558_v54, %v1557_v53  ;;  %v2205_v50 = vld [vmem:[%s5219_s7 + $0x155] sm:$0xff] }
  0x73   : > { %1089 = vmatprep.subr.mxu1 %v4122_v61  ;;  %v2124_v54 = vld [vmem:[%s5219_s7 + $0x13c] sm:$0xff] }
  0x75   : > { %3221 = vmatpush1.msk.msra.mxu0 %vm758_vm1, %v952_v56 }
  0x76   : > { %3224 = vmatpush1.msk.msra.mxu1 %vm758_vm1, %v1049_v57  ;;  %1021 = vmatmul.mubr.f32.vlgmr.msra.gmra.mrb[4].mxu0 %v4395_v4  ;;  %v1476_v57 = vld [vmem:[%s5219_s7 + $0x74] sm:$0xff] }
  0x77   : > { %1118 = vmatmul.mubr.f32.vlgmr.msra.gmra.mrb[4].mxu1 %v4395_v4  ;;  %3223 = vmatprep.mubr.msk.f32.mxu0 %vm751_vm0, %v4409_v11  ;;  %v1153_v4 = vld [vmem:[%s5219_s7 + $0x18] sm:$0x1]  ;;  %v3818_v63 = vpack.c.bf16 %v1477_v58, %v1476_v57  ;;  %v2366_v58 = vld [vmem:[%s5219_s7 + $0x17f] sm:$0xff] }
  0x78   : > { %3226 = vmatprep.mubr.msk.f32.mxu1 %vm751_vm0, %v4409_v11  ;;  %3793 = vmatprep.subr.bf16.mxu1 %v4120_v1  ;;  %v3797_v5 = vpack.c.bf16 %v1153_v4, %v1152_v3  ;;  %v1637_v3 = vld [vmem:[%s5219_s7 + $0x9e] sm:$0xff] }
  0x79   : > { %3786 = vmatprep.subr.bf16.mxu0 %v4120_v1  ;;  %3795 = vmatpush3.bf16.msra.mxu1 %v3794_v60  ;;  %v1717_v60 = vld [vmem:[%s5219_s7 + $0xaf] sm:$0xff]  ;;  %v2365_v57 = vld [vmem:[%s5219_s7 + $0x177] sm:$0xff] }
  0x7a   : > { %1026 = vmatmul.mubr.f32.gmra.mrb[6].mxu0 %v4415_v13  ;;  %3796 = vmatprep.subr.bf16.mxu1 %v4120_v1  ;;  %v3836_v4 = vpack.c.bf16 %v1718_v62, %v1717_v60  ;;  %v2284_v60 = vld [vmem:[%s5219_s7 + $0x15e] sm:$0xff]  ;;  %v2285_v62 = vld [vmem:[%s5219_s7 + $0x166] sm:$0xff] }
  0x7b   : > { %1123 = vmatmul.mubr.f32.gmra.mrb[6].mxu1 %v4415_v13  ;;  %3788 = vmatpush3.bf16.msra.mxu0 %v3787_v2  ;;  %v1636_v2 = vld [vmem:[%s5219_s7 + $0x96] sm:$0xff] }
  0x7c   : > { %3789 = vmatprep.subr.bf16.mxu0 %v4120_v1  ;;  %3442 = vmatprep.mubr.msk.f32.mxu1 %vm4124_vm5, %v4122_v61 }
  0x7d   : > { %3799 = vmatpush3.bf16.msk.msra.mxu1 %vm4507_vm4, %v3797_v5  ;;  %3431 = vmatprep.mubr.msk.f32.mxu0 %vm4124_vm5, %v4122_v61 }
  0x7e   : > { %3807 = vmatprep.subr.bf16.mxu1 %v4120_v1 }
  0x7f   : > { %3792 = vmatpush3.bf16.msk.msra.mxu0 %vm4507_vm4, %v3790_v9  ;;  %v3829_v9 = vpack.c.bf16 %v1637_v3, %v1636_v2  ;;  %v2367_v3 = vld [vmem:[%s5219_s7 + $0x187] sm:$0xff] }
  0x80   : > { %3800 = vmatprep.subr.bf16.mxu0 %v4120_v1 }
  0xa1   : > { %v1139_v25 = vpop.permute.xlu0 %1138 }
 0x122   : > { %v828_v10 = vpop.f32.mrb[0].mxu0 }
 0x123   : > { %v925_v11 = vpop.f32.mrb[0].mxu1  ;;  %v830_v12 = vpop.f32.mrb[1].mxu0 }
 0x124   : > { %v1128_v13 = vmax.f32 %v828_v10, %v925_v11  ;;  %v927_v14 = vpop.f32.mrb[1].mxu1  ;;  %v1638_v11 = vld [vmem:[%s5219_s7 + $0xa6] sm:$0xff]  ;;  %v1639_v12 = vld [vmem:[%s5219_s7 + $0xae] sm:$0x1] }
 0x125   : > { %v1879_v14 = vld [vmem:[%s5219_s7 + $0xe1] sm:$0xff] }
 0x127   : > { %v833_v15 = vpop.f32.mrb[2].mxu0 }
 0x128   : > { %v930_v16 = vpop.f32.mrb[2].mxu1  ;;  %v835_v17 = vpop.f32.mrb[3].mxu0 }
 0x129   : > { %v1129_v18 = vmax.f32 %v833_v15, %v930_v16  ;;  %v932_v19 = vpop.f32.mrb[3].mxu1  ;;  %v1880_v15 = vld [vmem:[%s5219_s7 + $0xe9] sm:$0xff]  ;;  %v3832_v16 = vpack.c.bf16 %v1639_v12, %v1638_v11 }
 0x12a   : > { %v1798_v17 = vld [vmem:[%s5219_s7 + $0xc8] sm:$0xff]  ;;  %v1144_v19 = vpop.permute.xlu0 %1143 }
 0x149   : > { %v1022_v20 = vpop.f32.mrb[4].mxu0 }
 0x14a   : > { %v1119_v21 = vpop.f32.mrb[4].mxu1  ;;  %v1024_v22 = vpop.f32.mrb[5].mxu0 }
 0x14b   : > { %v1130_v23 = vmax.f32 %v1022_v20, %v1119_v21  ;;  %v1121_v24 = vpop.f32.mrb[5].mxu1  ;;  %v3850_v20 = vpack.c.bf16 %v1880_v15, %v1879_v14  ;;  %v2449_v14 = vld [vmem:[%s5221_s9] sm:$0xff]  ;;  %v2450_v15 = vld [vmem:[%s5221_s9 + $0x8] sm:$0xff] }
 0x14c   : > { %v1882_v24 = vld [vmem:[%s5219_s7 + $0xf9] sm:$0x1] }
 0x14d   : > { %v1132_v26 = vmax.f32 %v1128_v13, %v1130_v23  ;;  %v1027_v27 = vpop.f32.mrb[6].mxu0  ;;  %v3839_v13 = vpack.c.bf16 %v1720_v8, %v1719_v7  ;;  %v1881_v23 = vld [vmem:[%s5219_s7 + $0xf1] sm:$0xff] }
 0x14e   : > { %v1124_v30 = vpop.f32.mrb[6].mxu1  ;;  %v1029_v0 = vpop.f32.mrb[7].mxu0  ;;  %v3853_v29 = vpack.c.bf16 %v1882_v24, %v1881_v23  ;;  %v2286_v8 = vld [vmem:[%s5219_s7 + $0x16e] sm:$0xff]  ;;  %v2456_v24 = vld [vmem:[%s5221_s9 + $0x38] sm:$0xff] }
 0x14f   : > { %v1146_v31 = vadd.f32 %v1139_v25, %v1132_v26  ;;  %v1131_v32 = vmax.f32 %v1027_v27, %v1124_v30  ;;  %v1126_v35 = vpop.f32.mrb[7].mxu1  ;;  %v1800_v27 = vld [vmem:[%s5219_s7 + $0xd8] sm:$0xff]  ;;  %v2455_v23 = vld [vmem:[%s5221_s9 + $0x30] sm:$0xff] }
 0x150   : > { %v2041_v0 = vld [vmem:[%s5219_s7 + $0x113] sm:$0xff] }
 0x151   : > { %v4540_v37 = vmax.f32 %v1146_v31, 0.0  ;;  %v4542_v38 = vmax.f32 %v1129_v18, %v1131_v32  ;;  %v1799_v18 = vld [vmem:[%s5219_s7 + $0xd0] sm:$0xff]  ;;  %v2042_v31 = vld [vmem:[%s5219_s7 + $0x11b] sm:$0xff]  ;;  %v3846_v32 = vpack.c.bf16 %v1801_v28, %v1800_v27  ;;  %v2458_v27 = vld [vmem:[%s5221_s9 + $0x48] sm:$0xff] }
 0x152   : > { %v3843_v25 = vpack.c.bf16 %v1799_v18, %v1798_v17  ;;  %v3864_v35 = vpack.c.bf16 %v2042_v31, %v2041_v0  ;;  %v2451_v17 = vld [vmem:[%s5221_s9 + $0x10] sm:$0xff]  ;;  %v2452_v18 = vld [vmem:[%s5221_s9 + $0x18] sm:$0xff]  ;;  %v2461_v31 = vld [vmem:[%s5221_s9 + $0x60] sm:$0xff] }
 0x153   : > { %3443 = vmatmul.mubr.msk.f32.vlgmr.msra.gmra.mrb[8].mxu1 %vm1160_vm6, %v4540_v37  ;;  %v1159_v42 = vrot.slane %v4540_v37, 1  ;;  %v1397_v52 = vrot.slane %v4540_v37, 3  ;;  %v1316_v56 = vrot.slane %v4540_v37, 2  ;;  %v1559_v5 = vrot.slane %v4540_v37, 5 }
 0x154   : > { %3809 = vmatpush3.bf16.msra.mxu1 %v3808_v36  ;;  %3464 = vmatprep.mubr.msk.f32.mxu1 %vm4124_vm5, %v4122_v61  ;;  %v1478_v10 = vrot.slane %v4540_v37, 4  ;;  %v1147_v21 = vadd.f32 %v1144_v19, %v4542_v38  ;;  %v1721_v22 = vrot.slane %v4540_v37, 7  ;;  %v1640_v26 = vrot.slane %v4540_v37, 6  ;;  %v2043_v37 = vld [vmem:[%s5219_s7 + $0x123] sm:$0xff]  ;;  %v2044_v38 = vld [vmem:[%s5219_s7 + $0x12b] sm:$0x1] }
 0x155   : > { %3432 = vmatmul.mubr.msk.f32.vlgmr.msra.gmra.mrb[8].mxu0 %vm1160_vm6, %v1159_v42  ;;  %3810 = vmatprep.subr.bf16.mxu1 %v4120_v1  ;;  %v3867_v42 = vpack.c.bf16 %v2044_v38, %v2043_v37  ;;  %v3902_v19 = vpack.c.bf16 %v2452_v18, %v2451_v17  ;;  %v2542_v37 = vld [vmem:[%s5223_s11 + $0x10] sm:$0xff] }
 0x156   : > { %3802 = vmatpush3.bf16.msra.mxu0 %v3801_v41  ;;  %3453 = vmatprep.mubr.msk.f32.mxu0 %vm4124_vm5, %v4122_v61  ;;  %v4682_v30 = vmax.f32 %v1147_v21, 0.0  ;;  %v1963_v41 = vld [vmem:[%s5219_s7 + $0x112] sm:$0x1]  ;;  %v2454_v21 = vld [vmem:[%s5221_s9 + $0x28] sm:$0xff] }
 0x157   : > { %3803 = vmatprep.subr.bf16.mxu0 %v4120_v1 }
 0x158   : > { %3813 = vmatpush3.bf16.msk.msra.mxu1 %vm4507_vm4, %v3811_v45  ;;  %v1883_v36 = vrot.slane %v4682_v30, 1  ;;  %v3860_v45 = vpack.c.bf16 %v1963_v41, %v1962_v40  ;;  %v2045_v49 = vrot.slane %v4682_v30, 3  ;;  %v1964_v53 = vrot.slane %v4682_v30, 2  ;;  %v2544_v41 = vld [vmem:[%s5223_s11 + $0x20] sm:$0xff] }
 0x159   : > { %3821 = vmatprep.subr.bf16.mxu1 %v4120_v1  ;;  %v2207_v2 = vrot.slane %v4682_v30, 5  ;;  %v2126_v7 = vrot.slane %v4682_v30, 4  ;;  %v2369_v12 = vrot.slane %v4682_v30, 7 }
 0x15a   : > { %3806 = vmatpush3.bf16.msk.msra.mxu0 %vm4507_vm4, %v3804_v48  ;;  %v3878_v48 = vpack.c.bf16 %v2204_v44, %v2203_v43  ;;  %v2546_v44 = vld [vmem:[%s5223_s11 + $0x30] sm:$0xff] }
 0x15b   : > { %3465 = vmatmul.mubr.msk.f32.vlgmr.msra.gmra.mrb[10].mxu1 %vm1160_vm6, %v1397_v52  ;;  %3814 = vmatprep.subr.bf16.mxu0 %v4120_v1  ;;  %v3871_v52 = vpack.c.bf16 %v2123_v47, %v2122_v46  ;;  %v2548_v47 = vld [vmem:[%s5223_s11 + $0x40] sm:$0xff] }
 0x15c   : > { %3823 = vmatpush3.bf16.msra.mxu1 %v3822_v51  ;;  %3486 = vmatprep.mubr.msk.f32.mxu1 %vm4124_vm5, %v4122_v61  ;;  %v2206_v51 = vld [vmem:[%s5219_s7 + $0x15d] sm:$0x1] }
 0x15d   : > { %3454 = vmatmul.mubr.msk.f32.vlgmr.msra.gmra.mrb[10].mxu0 %vm1160_vm6, %v1316_v56  ;;  %3824 = vmatprep.subr.bf16.mxu1 %v4120_v1  ;;  %v3881_v56 = vpack.c.bf16 %v2206_v51, %v2205_v50 }
 0x15e   : > { %3816 = vmatpush3.bf16.msra.mxu0 %v3815_v55  ;;  %3475 = vmatprep.mubr.msk.f32.mxu0 %vm4124_vm5, %v4122_v61  ;;  %v2125_v55 = vld [vmem:[%s5219_s7 + $0x144] sm:$0x1] }
 0x15f   : > { %3817 = vmatprep.subr.bf16.mxu0 %v4120_v1 }
 0x160   : > { %3827 = vmatpush3.bf16.msk.msra.mxu1 %vm4507_vm4, %v3825_v59  ;;  %v3874_v59 = vpack.c.bf16 %v2125_v55, %v2124_v54 }
 0x161   : > { %3835 = vmatprep.subr.bf16.mxu1 %v4120_v1 }
 0x162   : > { %3820 = vmatpush3.bf16.msk.msra.mxu0 %vm4507_vm4, %v3818_v63  ;;  %v3892_v63 = vpack.c.bf16 %v2366_v58, %v2365_v57 }
 0x163   : > { %3487 = vmatmul.mubr.msk.f32.vlgmr.msra.gmra.mrb[12].mxu1 %vm1160_vm6, %v1559_v5  ;;  %3828 = vmatprep.subr.bf16.mxu0 %v4120_v1  ;;  %v3885_v5 = vpack.c.bf16 %v2285_v62, %v2284_v60 }
 0x164   : > { %3837 = vmatpush3.bf16.msra.mxu1 %v3836_v4  ;;  %3508 = vmatprep.mubr.msk.f32.mxu1 %vm4124_vm5, %v4122_v61  ;;  %v2368_v4 = vld [vmem:[%s5219_s7 + $0x18f] sm:$0x1] }
 0x165   : > { %3476 = vmatmul.mubr.msk.f32.vlgmr.msra.gmra.mrb[12].mxu0 %vm1160_vm6, %v1478_v10  ;;  %3838 = vmatprep.subr.bf16.mxu1 %v4120_v1  ;;  %v3895_v10 = vpack.c.bf16 %v2368_v4, %v2367_v3 }
 0x166   : > { %3830 = vmatpush3.bf16.msra.mxu0 %v3829_v9  ;;  %3497 = vmatprep.mubr.msk.f32.mxu0 %vm4124_vm5, %v4122_v61  ;;  %v2287_v9 = vld [vmem:[%s5219_s7 + $0x176] sm:$0x1] }
 0x167   : > { %3831 = vmatprep.subr.bf16.mxu0 %v4120_v1  ;;  %v3888_v11 = vpack.c.bf16 %v2287_v9, %v2286_v8 }
 0x168   : > { %3841 = vmatpush3.bf16.msk.msra.mxu1 %vm4507_vm4, %v3839_v13  ;;  %v2288_v13 = vrot.slane %v4682_v30, 6 }
 0x169   : > { %3849 = vmatprep.subr.bf16.mxu1 %v4120_v1 }
 0x16a   : > { %3834 = vmatpush3.bf16.msk.msra.mxu0 %vm4507_vm4, %v3832_v16  ;;  %v3899_v16 = vpack.c.bf16 %v2450_v15, %v2449_v14 }
 0x16b   : > { %3509 = vmatmul.mubr.msk.f32.vlgmr.msra.gmra.mrb[14].mxu1 %vm1160_vm6, %v1721_v22  ;;  %3842 = vmatprep.subr.bf16.mxu0 %v4120_v1 }
 0x16c   : > { %3851 = vmatpush3.bf16.msra.mxu1 %v3850_v20  ;;  %3530 = vmatprep.mubr.msk.f32.mxu1 %vm4124_vm5, %v4122_v61  ;;  %v2453_v20 = vld [vmem:[%s5221_s9 + $0x20] sm:$0xff] }
 0x16d   : > { %3498 = vmatmul.mubr.msk.f32.vlgmr.msra.gmra.mrb[14].mxu0 %vm1160_vm6, %v1640_v26  ;;  %3852 = vmatprep.subr.bf16.mxu1 %v4120_v1  ;;  %v3905_v22 = vpack.c.bf16 %v2454_v21, %v2453_v20  ;;  %v2457_v26 = vld [vmem:[%s5221_s9 + $0x40] sm:$0xff] }
 0x16e   : > { %3844 = vmatpush3.bf16.msra.mxu0 %v3843_v25  ;;  %3519 = vmatprep.mubr.msk.f32.mxu0 %vm4124_vm5, %v4122_v61  ;;  %v3908_v25 = vpack.c.bf16 %v2456_v24, %v2455_v23  ;;  %v3911_v28 = vpack.c.bf16 %v2458_v27, %v2457_v26 }
 0x16f   : > { %3845 = vmatprep.subr.bf16.mxu0 %v4120_v1 }
 0x170   : > { %3855 = vmatpush3.bf16.msk.msra.mxu1 %vm4507_vm4, %v3853_v29  ;;  %v2459_v29 = vld [vmem:[%s5221_s9 + $0x50] sm:$0xff] }
 0x171   : > { %3863 = vmatprep.subr.bf16.mxu1 %v4120_v1 }
 0x172   : > { %3848 = vmatpush3.bf16.msk.msra.mxu0 %vm4507_vm4, %v3846_v32  ;;  %v2462_v32 = vld [vmem:[%s5221_s9 + $0x68] sm:$0xff] }
 0x173   : > { %3531 = vmatmul.mubr.msk.f32.vlgmr.msra.gmra.mrb[16].mxu1 %vm1160_vm6, %v1883_v36  ;;  %3856 = vmatprep.subr.bf16.mxu0 %v4120_v1  ;;  %v3917_v33 = vpack.c.bf16 %v2462_v32, %v2461_v31  ;;  %v2541_v36 = vld [vmem:[%s5223_s11 + $0x8] sm:$0xff] }
 0x174   : > { %3865 = vmatpush3.bf16.msra.mxu1 %v3864_v35  ;;  %3552 = vmatprep.mubr.msk.f32.mxu1 %vm4124_vm5, %v4122_v61  ;;  %v2540_v35 = vld [vmem:[%s5223_s11] sm:$0xff] }
 0x175   : > { %3520 = vmatmul.mubr.msk.f32.vlgmr.msra.gmra.mrb[16].mxu0 %vm1160_vm6, %v4682_v30  ;;  %3866 = vmatprep.subr.bf16.mxu1 %v4120_v1  ;;  %v2460_v30 = vld [vmem:[%s5221_s9 + $0x58] sm:$0xff]  ;;  %v3920_v38 = vpack.c.bf16 %v2541_v36, %v2540_v35  ;;  %v2446_v35 = vld [vmem:[%s5220_s8] sm:$0x1] }
 0x176   : > { %3858 = vmatpush3.bf16.msra.mxu0 %v3857_v39  ;;  %3541 = vmatprep.mubr.msk.f32.mxu0 %vm4124_vm5, %v4122_v61  ;;  %v3914_v0 = vpack.c.bf16 %v2460_v30, %v2459_v29  ;;  %v2543_v39 = vld [vmem:[%s5223_s11 + $0x18] sm:$0xff] }
 0x177   : > { %3859 = vmatprep.subr.bf16.mxu0 %v4120_v1  ;;  %v3923_v40 = vpack.c.bf16 %v2543_v39, %v2542_v37  ;;  %v2550_v39 = vld [vmem:[%s5223_s11 + $0x50] sm:$0xf] }
 0x178   : > { %3869 = vmatpush3.bf16.msk.msra.mxu1 %vm4507_vm4, %v3867_v42  ;;  %v2545_v42 = vld [vmem:[%s5223_s11 + $0x28] sm:$0xff] }
 0x179   : > { %3877 = vmatprep.subr.bf16.mxu1 %v4120_v1  ;;  %v3926_v43 = vpack.c.bf16 %v2545_v42, %v2544_v41  ;;  %v2631_v41 = vld [vmem:[%s5225_s13] sm:$0xff]  ;;  %v2632_v42 = vld [vmem:[%s5225_s13 + $0x8] sm:$0x3] }
 0x17a   : > { %3862 = vmatpush3.bf16.msk.msra.mxu0 %vm4507_vm4, %v3860_v45  ;;  %v2547_v45 = vld [vmem:[%s5223_s11 + $0x38] sm:$0xff] }
 0x17b   : > { %3553 = vmatmul.mubr.msk.f32.vlgmr.msra.gmra.mrb[18].mxu1 %vm1160_vm6, %v2045_v49  ;;  %3870 = vmatprep.subr.bf16.mxu0 %v4120_v1  ;;  %v3929_v46 = vpack.c.bf16 %v2547_v45, %v2546_v44  ;;  %v2714_v44 = vld [vmem:[%s5227_s15 + $0x8] sm:$0xff]  ;;  %v2716_v45 = vld [vmem:[%s5227_s15 + $0x18] sm:$0xff] }
 0x17c   : > { %3879 = vmatpush3.bf16.msra.mxu1 %v3878_v48  ;;  %3574 = vmatprep.mubr.msk.f32.mxu1 %vm4124_vm5, %v4122_v61  ;;  %v2549_v48 = vld [vmem:[%s5223_s11 + $0x48] sm:$0xff] }
 0x17d   : > { %3542 = vmatmul.mubr.msk.f32.vlgmr.msra.gmra.mrb[18].mxu0 %vm1160_vm6, %v1964_v53  ;;  %3880 = vmatprep.subr.bf16.mxu1 %v4120_v1  ;;  %v3932_v49 = vpack.c.bf16 %v2549_v48, %v2548_v47  ;;  %v3935_v48 = vpack.c.bf16 %v2632_v42, %v2631_v41  ;;  %v2848_v41 = vld [vmem:[%s5229_s17 + $0x90] sm:$0xff]  ;;  %v2849_v42 = vld [vmem:[%s5229_s17 + $0x98] sm:$0xff] }
 0x17e   : > { %3872 = vmatpush3.bf16.msra.mxu0 %v3871_v52  ;;  %3563 = vmatprep.mubr.msk.f32.mxu0 %vm4124_vm5, %v4122_v61 }
 0x17f   : > { %3873 = vmatprep.subr.bf16.mxu0 %v4120_v1 }
 0x180   : > { %3883 = vmatpush3.bf16.msk.msra.mxu1 %vm4507_vm4, %v3881_v56 }
 0x181   : > { %3891 = vmatprep.subr.bf16.mxu1 %v4120_v1 }
 0x182   : > { %3876 = vmatpush3.bf16.msk.msra.mxu0 %vm4507_vm4, %v3874_v59 }
 0x183   : > { %3575 = vmatmul.mubr.msk.f32.vlgmr.msra.gmra.mrb[20].mxu1 %vm1160_vm6, %v2207_v2  ;;  %3884 = vmatprep.subr.bf16.mxu0 %v4120_v1 }
 0x184   : > { %3893 = vmatpush3.bf16.msra.mxu1 %v3892_v63  ;;  %3596 = vmatprep.mubr.msk.f32.mxu1 %vm4124_vm5, %v4122_v61 }
 0x185   : > { %3564 = vmatmul.mubr.msk.f32.vlgmr.msra.gmra.mrb[20].mxu0 %vm1160_vm6, %v2126_v7  ;;  %3894 = vmatprep.subr.bf16.mxu1 %v4120_v1 }
 0x186   : > { %3886 = vmatpush3.bf16.msra.mxu0 %v3885_v5  ;;  %3585 = vmatprep.mubr.msk.f32.mxu0 %vm4124_vm5, %v4122_v61 }
 0x187   : > { %3887 = vmatprep.subr.bf16.mxu0 %v4120_v1 }
 0x188   : > { %3897 = vmatpush3.bf16.msk.msra.mxu1 %vm4507_vm4, %v3895_v10 }
 0x189   : > { %3919 = vmatprep.subr.bf16.mxu1 %v4120_v1 }
 0x18a   : > { %3890 = vmatpush3.bf16.msk.msra.mxu0 %vm4507_vm4, %v3888_v11 }
 0x18b   : > { %3597 = vmatmul.mubr.msk.f32.vlgmr.msra.gmra.mrb[22].mxu1 %vm1160_vm6, %v2369_v12  ;;  %3898 = vmatprep.subr.bf16.mxu0 %v4120_v1 }
 0x18c   : > { %3654 = vmatprep.mubr.msk.f32.mxu1 %vm4124_vm5, %v4122_v61  ;;  %3921 = vmatpush3.bf16.msra.mxu1 %v3920_v38 }
 0x18d   : > { %3586 = vmatmul.mubr.msk.f32.vlgmr.msra.gmra.mrb[22].mxu0 %vm1160_vm6, %v2288_v13  ;;  %3922 = vmatprep.subr.bf16.mxu1 %v4120_v1 }
 0x18e   : > { %3629 = vmatprep.mubr.msk.f32.mxu0 %vm4124_vm5, %v4122_v61  ;;  %3900 = vmatpush3.bf16.msra.mxu0 %v3899_v16 }
 0x18f   : > { %3901 = vmatprep.subr.bf16.mxu0 %v4120_v1 }
 0x190   : > { %3924 = vmatpush3.bf16.msra.mxu1 %v3923_v40  ;;  %v2464_v40 = vld [vmem:[%s5222_s10] sm:$0x1] }
 0x191   : > { %3925 = vmatprep.subr.bf16.mxu1 %v4120_v1 }
 0x192   : > { %3903 = vmatpush3.bf16.msra.mxu0 %v3902_v19 }
 0x193   : > { %3904 = vmatprep.subr.bf16.mxu0 %v4120_v1 }
 0x194   : > { %3927 = vmatpush3.bf16.msra.mxu1 %v3926_v43 }
 0x195   : > { %3928 = vmatprep.subr.bf16.mxu1 %v4120_v1 }
 0x196   : > { %3906 = vmatpush3.bf16.msra.mxu0 %v3905_v22 }
 0x197   : > { %3907 = vmatprep.subr.bf16.mxu0 %v4120_v1 }
 0x198   : > { %3930 = vmatpush3.bf16.msra.mxu1 %v3929_v46 }
 0x199   : > { %3931 = vmatprep.subr.bf16.mxu1 %v4120_v1 }
 0x19a   : > { %3909 = vmatpush3.bf16.msra.mxu0 %v3908_v25 }
 0x19b   : > { %3910 = vmatprep.subr.bf16.mxu0 %v4120_v1 }
 0x19c   : > { %3933 = vmatpush3.bf16.msra.mxu1 %v3932_v49 }
 0x19d   : > { %3652 = vmatprep.subr.mxu1 %v4122_v61 }
 0x19e   : > { %3912 = vmatpush3.bf16.msra.mxu0 %v3911_v28 }
 0x19f   : > { %3913 = vmatprep.subr.bf16.mxu0 %v4120_v1 }
 0x1a0   : > { %3653 = vmatpush3.msk.msra.mxu1 %vm2556_vm8, %v2550_v39 }
 0x1a1   : > { %3934 = vmatprep.subr.bf16.mxu1 %v4120_v1 }
 0x1a2   : > { %3915 = vmatpush3.bf16.msra.mxu0 %v3914_v0 }
 0x1a3   : > { %3916 = vmatprep.subr.bf16.mxu0 %v4120_v1 }
 0x1a6   : > { %3918 = vmatpush3.bf16.msra.mxu0 %v3917_v33 }
 0x1a7   : > { %3627 = vmatprep.subr.mxu0 %v4122_v61 }
 0x1aa   : > { %3628 = vmatpush3.msra.mxu0 %v2463_v34 }
 0x226   : > { %v1308_v50 = vpop.f32.mrb[8].mxu1 }
 0x227   : > { %v3444_v51 = vpop.f32.mrb[9].mxu1 }
 0x228   : > { %v1233_v52 = vpop.f32.mrb[8].mxu0  ;;  %v2713_v51 = vld [vmem:[%s5227_s15] sm:$0xff] }
 0x229   : > { %v1309_v53 = vadd.f32 %v1308_v50, %v1233_v52  ;;  %v3433_v54 = vpop.f32.mrb[9].mxu0  ;;  %v3938_v50 = vpack.c.bf16 %v2716_v45, %v2714_v44  ;;  %v2715_v52 = vld [vmem:[%s5227_s15 + $0x10] sm:$0xff]  ;;  %v3974_v44 = vpack.c.bf16 %v2849_v42, %v2848_v41 }
 0x22a   : > { %v2720_v54 = vld [vmem:[%s5227_s15 + $0x38] sm:$0xff]  ;;  %v2832_v45 = vld [vmem:[%s5229_s17 + $0x10] sm:$0xff] }
 0x22e   : > { %v1469_v55 = vpop.f32.mrb[10].mxu1 }
 0x22f   : > { %v3466_v56 = vpop.f32.mrb[11].mxu1 }
 0x230   : > { %v1388_v57 = vpop.f32.mrb[10].mxu0  ;;  %v3940_v56 = vpack.c.bf16 %v2715_v52, %v2713_v51  ;;  %v2834_v51 = vld [vmem:[%s5229_s17 + $0x20] sm:$0xff]  ;;  %v2835_v52 = vld [vmem:[%s5229_s17 + $0x28] sm:$0xff] }
 0x231   : > { %v1392_v58 = vadd.f32 %v1388_v57, %v1309_v53  ;;  %v3455_v59 = vpop.f32.mrb[11].mxu0  ;;  %v2718_v53 = vld [vmem:[%s5227_s15 + $0x28] sm:$0xff] }
 0x232   : > { %v3942_v57 = vpack.c.bf16 %v2720_v54, %v2718_v53  ;;  %v2719_v59 = vld [vmem:[%s5227_s15 + $0x30] sm:$0xff]  ;;  %v2853_v54 = vld [vmem:[%s5229_s17 + $0xb8] sm:$0xff] }
 0x233   : > { %v1473_v60 = vadd.f32 %v1469_v55, %v1392_v58  ;;  %v2630_v55 = vld [vmem:[%s727_s4] sm:$0x1]  ;;  %v2852_v53 = vld [vmem:[%s5229_s17 + $0xb0] sm:$0xff] }
 0x234   : > { %v2717_v58 = vld [vmem:[%s5227_s15 + $0x20] sm:$0xff] }
 0x236   : > { %v1631_v62 = vpop.f32.mrb[12].mxu1 }
 0x237   : > { %v3488_v63 = vpop.f32.mrb[13].mxu1 }
 0x238   : > { %v1550_v2 = vpop.f32.mrb[12].mxu0  ;;  %v3944_v63 = vpack.c.bf16 %v2719_v59, %v2717_v58  ;;  %v2837_v58 = vld [vmem:[%s5229_s17 + $0x38] sm:$0xff]  ;;  %v2854_v59 = vld [vmem:[%s5229_s17 + $0xc0] sm:$0xff] }
 0x239   : > { %v1554_v3 = vadd.f32 %v1550_v2, %v1473_v60  ;;  %v3477_v4 = vpop.f32.mrb[13].mxu0  ;;  %v2722_v60 = vld [vmem:[%s5227_s15 + $0x48] sm:$0xff] }
 0x23a   : > { %v2723_v4 = vld [vmem:[%s5227_s15 + $0x50] sm:$0xff] }
 0x23b   : > { %v1635_v5 = vadd.f32 %v1631_v62, %v1554_v3  ;;  %v2724_v62 = vld [vmem:[%s5227_s15 + $0x58] sm:$0xff]  ;;  %v2721_v3 = vld [vmem:[%s5227_s15 + $0x40] sm:$0xff] }
 0x23c   : > { %v3946_v2 = vpack.c.bf16 %v2724_v62, %v2722_v60  ;;  %v2855_v60 = vld [vmem:[%s5229_s17 + $0xc8] sm:$0xff] }
 0x23e   : > { %v1793_v7 = vpop.f32.mrb[14].mxu1 }
 0x23f   : > { %v3510_v8 = vpop.f32.mrb[15].mxu1 }
 0x240   : > { %v1712_v9 = vpop.f32.mrb[14].mxu0  ;;  %v3948_v8 = vpack.c.bf16 %v2723_v4, %v2721_v3  ;;  %v2839_v3 = vld [vmem:[%s5229_s17 + $0x48] sm:$0xff]  ;;  %v2856_v4 = vld [vmem:[%s5229_s17 + $0xd0] sm:$0xff] }
 0x241   : > { %v1716_v10 = vadd.f32 %v1712_v9, %v1635_v5  ;;  %v3499_v11 = vpop.f32.mrb[15].mxu0  ;;  %v2726_v5 = vld [vmem:[%s5227_s15 + $0x68] sm:$0xff] }
 0x242   : > { %v2727_v11 = vld [vmem:[%s5227_s15 + $0x70] sm:$0xff] }
 0x243   : > { %v1797_v12 = vadd.f32 %v1793_v7, %v1716_v10  ;;  %v2728_v7 = vld [vmem:[%s5227_s15 + $0x78] sm:$0xff]  ;;  %v2725_v10 = vld [vmem:[%s5227_s15 + $0x60] sm:$0xff] }
 0x244   : > { %v3950_v9 = vpack.c.bf16 %v2728_v7, %v2726_v5  ;;  %v2857_v5 = vld [vmem:[%s5229_s17 + $0xd8] sm:$0xff] }
 0x246   : > { %v1955_v13 = vpop.f32.mrb[16].mxu1 }
 0x247   : > { %v3532_v14 = vpop.f32.mrb[17].mxu1 }
 0x248   : > { %v1874_v15 = vpop.f32.mrb[16].mxu0  ;;  %v3952_v14 = vpack.c.bf16 %v2727_v11, %v2725_v10  ;;  %v2841_v10 = vld [vmem:[%s5229_s17 + $0x58] sm:$0xff]  ;;  %v2858_v11 = vld [vmem:[%s5229_s17 + $0xe0] sm:$0xff] }
 0x249   : > { %v1878_v16 = vadd.f32 %v1874_v15, %v1797_v12  ;;  %v3521_v17 = vpop.f32.mrb[17].mxu0  ;;  %v2730_v12 = vld [vmem:[%s5227_s15 + $0x88] sm:$0xff] }
 0x24a   : > { %v2731_v17 = vld [vmem:[%s5227_s15 + $0x90] sm:$0xff] }
 0x24b   : > { %v1959_v18 = vadd.f32 %v1955_v13, %v1878_v16  ;;  %v2732_v13 = vld [vmem:[%s5227_s15 + $0x98] sm:$0xff]  ;;  %v2729_v16 = vld [vmem:[%s5227_s15 + $0x80] sm:$0xff] }
 0x24c   : > { %v3954_v15 = vpack.c.bf16 %v2732_v13, %v2730_v12  ;;  %v2859_v12 = vld [vmem:[%s5229_s17 + $0xe8] sm:$0xff] }
 0x24e   : > { %v2117_v19 = vpop.f32.mrb[18].mxu1 }
 0x24f   : > { %v3554_v20 = vpop.f32.mrb[19].mxu1 }
 0x250   : > { %v2036_v21 = vpop.f32.mrb[18].mxu0  ;;  %v3956_v20 = vpack.c.bf16 %v2731_v17, %v2729_v16  ;;  %v2633_v17 = vld [vmem:[%s5226_s14] sm:$0x1] }
 0x251   : > { %v2040_v22 = vadd.f32 %v2036_v21, %v1959_v18  ;;  %v3543_v23 = vpop.f32.mrb[19].mxu0  ;;  %v2734_v18 = vld [vmem:[%s5227_s15 + $0xa8] sm:$0xff] }
 0x252   : > { %v2735_v23 = vld [vmem:[%s5227_s15 + $0xb0] sm:$0xff] }
 0x253   : > { %v2121_v24 = vadd.f32 %v2117_v19, %v2040_v22  ;;  %v2736_v19 = vld [vmem:[%s5227_s15 + $0xb8] sm:$0xff]  ;;  %v2733_v22 = vld [vmem:[%s5227_s15 + $0xa0] sm:$0xff] }
 0x254   : > { %v3958_v21 = vpack.c.bf16 %v2736_v19, %v2734_v18  ;;  %v2935_v18 = vld [vmem:[%s5231_s19 + $0x9] sm:$0xff]  ;;  %v2936_v19 = vld [vmem:[%s5231_s19 + $0x11] sm:$0x1] }
 0x256   : > { %v2279_v25 = vpop.f32.mrb[20].mxu1 }
 0x257   : > { %v3576_v26 = vpop.f32.mrb[21].mxu1 }
 0x258   : > { %v2198_v27 = vpop.f32.mrb[20].mxu0  ;;  %v2740_v26 = vld [vmem:[%s5227_s15 + $0xd8] sm:$0xff] }
 0x259   : > { %v2202_v28 = vadd.f32 %v2198_v27, %v2121_v24  ;;  %v3565_v29 = vpop.f32.mrb[21].mxu0  ;;  %v3960_v24 = vpack.c.bf16 %v2735_v23, %v2733_v22  ;;  %v4003_v23 = vpack.c.bf16 %v2936_v19, %v2935_v18 }
 0x25a   : > { %v2739_v29 = vld [vmem:[%s5227_s15 + $0xd0] sm:$0xff] }
 0x25b   : > { %v2283_v30 = vadd.f32 %v2279_v25, %v2202_v28  ;;  %v2738_v25 = vld [vmem:[%s5227_s15 + $0xc8] sm:$0xff]  ;;  %v2737_v28 = vld [vmem:[%s5227_s15 + $0xc0] sm:$0xff] }
 0x25c   : > { %v3962_v27 = vpack.c.bf16 %v2740_v26, %v2738_v25  ;;  %v2551_v25 = vld [vmem:[%s5224_s12] sm:$0x1] }
 0x25e   : > { %v2441_v0 = vpop.f32.mrb[22].mxu1 }
 0x25f   : > { %v3598_v31 = vpop.f32.mrb[23].mxu1 }
 0x260   : > { %v2360_v32 = vpop.f32.mrb[22].mxu0  ;;  %v2744_v31 = vld [vmem:[%s5227_s15 + $0xf8] sm:$0xff] }
 0x261   : > { %v2364_v33 = vadd.f32 %v2360_v32, %v2283_v30  ;;  %v3587_v34 = vpop.f32.mrb[23].mxu0  ;;  %v3964_v30 = vpack.c.bf16 %v2739_v29, %v2737_v28  ;;  %v2843_v28 = vld [vmem:[%s5229_s17 + $0x68] sm:$0xff] }
 0x262   : > { %v2743_v34 = vld [vmem:[%s5227_s15 + $0xf0] sm:$0xff] }
 0x263   : > { %v2445_v36 = vadd.f32 %v2441_v0, %v2364_v33  ;;  %v2742_v0 = vld [vmem:[%s5227_s15 + $0xe8] sm:$0xff]  ;;  %v2741_v33 = vld [vmem:[%s5227_s15 + $0xe0] sm:$0xff] }
 0x264   : > { %v3966_v32 = vpack.c.bf16 %v2744_v31, %v2742_v0  ;;  %v2861_v0 = vld [vmem:[%s5229_s17 + $0xf8] sm:$0xff] }
 0x265   : > { %v2447_v37 = vadd.f32 %v2446_v35, %v2445_v36  ;;  %v3968_v35 = vpack.c.bf16 %v2743_v34, %v2741_v33  ;;  %v2846_v36 = vld [vmem:[%s5229_s17 + $0x80] sm:$0xff]  ;;  %v2845_v33 = vld [vmem:[%s5229_s17 + $0x78] sm:$0xff] }
 0x267   : > { %v2448_v38 = vmax.f32 %v2447_v37, 0.0  ;;  %v2847_v37 = vld [vmem:[%s5229_s17 + $0x88] sm:$0xff] }
 0x268   : > { %v3970_v39 = vpack.c.bf16 %v2847_v37, %v2846_v36 }
 0x269   : > { %3630 = vmatmul.mubr.msk.f32.vlgmr.msra.gmra.mrb[24].mxu0 %vm2465_vm7, %v2448_v38  ;;  %v2830_v38 = vld [vmem:[%s5229_s17] sm:$0xff] }
 0x26a   : > { %3971 = vmatprep.subr.bf16.mxu0 %v3970_v39 }
 0x33c   : > { %v2535_v43 = vpop.f32.mrb[24].mxu0 }
 0x33d   : > { %v2536_v46 = vadd.f32 %v2535_v43, %v2464_v40  ;;  %v3631_v47 = vpop.f32.mrb[25].mxu0  ;;  %v2831_v40 = vld [vmem:[%s5229_s17 + $0x8] sm:$0xff] }
 0x33e   : > { %v3972_v43 = vpack.c.bf16 %v2831_v40, %v2830_v38  ;;  %v2850_v47 = vld [vmem:[%s5229_s17 + $0xa0] sm:$0xff] }
 0x33f   : > { %v2539_v49 = vmax.f32 %v2536_v46, 0.0  ;;  %v2833_v46 = vld [vmem:[%s5229_s17 + $0x18] sm:$0xff]  ;;  %v2745_v38 = vld [vmem:[%s5228_s16] sm:$0x3] }
 0x340   : > { %3973 = vmatpush3.bf16.msra.mxu0 %v3972_v43 }
 0x341   : > { %3655 = vmatmul.mubr.msk.f32.vlgmr.msra.gmra.mrb[24].mxu1 %vm2552_vm10, %v2539_v49  ;;  %v3976_v49 = vpack.c.bf16 %v2833_v46, %v2832_v45  ;;  %3975 = vmatprep.subr.bf16.mxu0 %v3974_v44 }
 0x342   : > { %3937 = vmatpush3.bf16.msk.msra.mxu1 %vm3936_vm11, %v3935_v48  ;;  %3661 = vmatprep.mubr.msk.f32.mxu1 %vm4124_vm5, %v4122_v61  ;;  %v2851_v48 = vld [vmem:[%s5229_s17 + $0xa8] sm:$0xff] }
 0x343   : > { %3939 = vmatprep.subr.bf16.mxu1 %v3938_v50  ;;  %v3978_v50 = vpack.c.bf16 %v2851_v48, %v2850_v47 }
 0x344   : > { %3977 = vmatpush3.bf16.msra.mxu0 %v3976_v49 }
 0x345   : > { %3662 = vmatmul.mubr.msk.f32.vlgmr.msra.gmra.mrb[26].mxu1 %vm2634_vm12, %v2630_v55  ;;  %v3980_v55 = vpack.c.bf16 %v2835_v52, %v2834_v51  ;;  %3979 = vmatprep.subr.bf16.mxu0 %v3978_v50  ;;  %v2934_v50 = vld [vmem:[%s5231_s19 + $0x8] sm:$0x1] }
 0x346   : > { %3941 = vmatpush1.bf16.msra.mxu1 %v3940_v56  ;;  %2821 = vmatprep.mubr.f32.mxu1 %v4122_v61  ;;  %v3982_v56 = vpack.c.bf16 %v2853_v54, %v2852_v53  ;;  %v2862_v53 = vld [vmem:[%s5230_s18] sm:$0x1] }
 0x347   : > { %3943 = vmatprep.subr.bf16.mxu1 %v3942_v57  ;;  %v2836_v57 = vld [vmem:[%s5229_s17 + $0x30] sm:$0xff] }
 0x348   : > { %3981 = vmatpush3.bf16.msra.mxu0 %v3980_v55  ;;  %v3984_v62 = vpack.c.bf16 %v2837_v58, %v2836_v57  ;;  %v3090_v57 = vld [vmem:[%s5232_s20] sm:$0x1] }
 0x349   : > { %3983 = vmatprep.subr.bf16.mxu0 %v3982_v56 }
 0x34a   : > { %3945 = vmatpush1.bf16.msra.mxu1 %v3944_v63  ;;  %v3986_v63 = vpack.c.bf16 %v2855_v60, %v2854_v59 }
 0x34b   : > { %3947 = vmatprep.subr.bf16.mxu1 %v3946_v2  ;;  %v2838_v2 = vld [vmem:[%s5229_s17 + $0x40] sm:$0xff] }
 0x34c   : > { %3985 = vmatpush3.bf16.msra.mxu0 %v3984_v62  ;;  %v3988_v7 = vpack.c.bf16 %v2839_v3, %v2838_v2 }
 0x34d   : > { %3987 = vmatprep.subr.bf16.mxu0 %v3986_v63 }
 0x34e   : > { %3949 = vmatpush1.bf16.msra.mxu1 %v3948_v8  ;;  %v3990_v8 = vpack.c.bf16 %v2857_v5, %v2856_v4 }
 0x34f   : > { %3951 = vmatprep.subr.bf16.mxu1 %v3950_v9  ;;  %v2840_v9 = vld [vmem:[%s5229_s17 + $0x50] sm:$0xff] }
 0x350   : > { %3989 = vmatpush3.bf16.msra.mxu0 %v3988_v7  ;;  %v3992_v13 = vpack.c.bf16 %v2841_v10, %v2840_v9 }
 0x351   : > { %3991 = vmatprep.subr.bf16.mxu0 %v3990_v8 }
 0x352   : > { %3953 = vmatpush1.bf16.msra.mxu1 %v3952_v14  ;;  %v3994_v14 = vpack.c.bf16 %v2859_v12, %v2858_v11 }
 0x353   : > { %3955 = vmatprep.subr.bf16.mxu1 %v3954_v15 }
 0x354   : > { %3993 = vmatpush3.bf16.msra.mxu0 %v3992_v13 }
 0x355   : > { %3995 = vmatprep.subr.bf16.mxu0 %v3994_v14 }
 0x356   : > { %3957 = vmatpush1.bf16.msra.mxu1 %v3956_v20 }
 0x357   : > { %3959 = vmatprep.subr.bf16.mxu1 %v3958_v21 }
 0x35a   : > { %3961 = vmatpush1.bf16.msra.mxu1 %v3960_v24 }
 0x35b   : > { %3963 = vmatprep.subr.bf16.mxu1 %v3962_v27  ;;  %v2842_v27 = vld [vmem:[%s5229_s17 + $0x60] sm:$0xff] }
 0x35c   : > { %v3996_v29 = vpack.c.bf16 %v2843_v28, %v2842_v27 }
 0x35e   : > { %3965 = vmatpush1.bf16.msra.mxu1 %v3964_v30  ;;  %3997 = vmatpush3.bf16.msra.mxu0 %v3996_v29  ;;  %v2860_v30 = vld [vmem:[%s5229_s17 + $0xf0] sm:$0xff] }
 0x35f   : > { %3967 = vmatprep.subr.bf16.mxu1 %v3966_v32  ;;  %v3998_v31 = vpack.c.bf16 %v2861_v0, %v2860_v30  ;;  %v2844_v32 = vld [vmem:[%s5229_s17 + $0x70] sm:$0xff] }
 0x360   : > { %v4000_v34 = vpack.c.bf16 %v2845_v33, %v2844_v32 }
 0x361   : > { %3999 = vmatprep.subr.bf16.mxu0 %v3998_v31 }
 0x362   : > { %3969 = vmatpush1.bf16.msra.mxu1 %v3968_v35  ;;  %4001 = vmatpush3.bf16.msra.mxu0 %v4000_v34  ;;  %v2747_v35 = vlaneseq }
 0x363   : > { %4002 = vmatprep.subr.bf16.mxu1 %v4120_v1  ;;  %4006 = vmatprep.subr.bf16.mxu0 %v4120_v1  ;;  %v2933_v1 = vld [vmem:[%s5231_s19] sm:$0xff] }
 0x364   : > { %v2748_v36 = vshrl.u32 %v2747_v35, 7  ;;  %v4007_v51 = vpack.c.bf16 %v2934_v50, %v2933_v1 }
 0x366   : > { %v2749_v37 = vsub.s32 0, %v2748_v36  ;;  %v2753_v39 = vsub.s32 1, %v2748_v36 }
 0x368   : > { %v2750_v40 = vrot.slane %v2745_v38, %v2749_v37  ;;  %v2754_v41 = vrot.slane %v2745_v38, %v2753_v39 }
 0x414   : > { %v2626_v15 = vpop.f32.mrb[24].mxu1 }
 0x415   : > { %v3656_v16 = vpop.f32.mrb[25].mxu1  ;;  %v2627_v26 = vadd.f32 %v2626_v15, %v2551_v25 }
 0x418   : > { %v2708_v20 = vpop.f32.mrb[26].mxu1 }
 0x419   : > { %v2709_v21 = vadd.f32 %v2708_v20, %v2633_v17  ;;  %v3663_v22 = vpop.f32.mrb[27].mxu1 }
 0x41b   : > { %v2712_v24 = vmax.f32 %v2709_v21, 0.0 }
 0x41d   : > { %2822 = vmatmul.mubr.f32.vlgmr.msra.gmra.mrb[28].mxu1 %v2712_v24 }
 0x41e   : > { %4005 = vmatpush3.bf16.msk.msra.mxu1 %vm4507_vm4, %v4003_v23  ;;  %3668 = vmatprep.mubr.msk.f32.mxu1 %vm4124_vm5, %v4122_v61 }
 0x421   : > { %3669 = vmatmul.mubr.msk.f32.vlgmr.msra.gmra.mrb[30].mxu1 %vm2937_vm13, %v2627_v26 }
 0x4f0   : > { %v2823_v42 = vpop.f32.mrb[28].mxu1 }
 0x4f1   : > { %v2824_v43 = vadd.f32 %v2823_v42, %v2750_v40  ;;  %v2825_v44 = vpop.f32.mrb[29].mxu1 }
 0x4f2   : > { %v2826_v45 = vadd.f32 %v2825_v44, %v2754_v41 }
 0x4f3   : > { %v2828_v48 = vmax.f32 %v2824_v43, 0.0 }
 0x4f4   : > { %v2829_v46 = vmax.f32 %v2826_v45, 0.0  ;;  %v3010_v47 = vpop.f32.mrb[30].mxu1 }
 0x4f5   : > { %v3670_v49 = vpop.f32.mrb[31].mxu1 }
 0x4f6   : > { %2927 = vmatprep.mubr.f32.mxu0 %v2829_v46 }
 0x4f7   : > { %2928 = vmatmul.mubr.f32.vlgmr.msra.gmra.mrb[26].mxu0 %v2828_v48 }
 0x4f8   : > { %3675 = vmatprep.mubr.msk.f32.mxu0 %vm4124_vm5, %v4122_v61  ;;  %4009 = vmatpush3.bf16.msk.msra.mxu0 %vm4507_vm4, %v4007_v51 }
 0x5ca   : > { %v3414_v52 = vpop.f32.mrb[26].mxu0 }
 0x5cb   : > { %v3415_v54 = vpop.f32.mrb[27].mxu0 }
 0x5cc   : > { %v3416_v55 = vadd.f32 %v3415_v54, %v3414_v52 }
 0x5ce   : > { %v2930_v61 = vadd.f32 %v3416_v55, %v2862_v53 }
 0x5d0   : > { %3676 = vmatmul.mubr.msk.f32.vlgmr.msra.gmra.mrb[28].mxu0 %vm2937_vm13, %v2930_v61 }
 0x6a3   : > { %v3086_v56 = vpop.f32.mrb[28].mxu0 }
 0x6a4   : > { %v3087_v6 = vadd.f32 %v3086_v56, %v3010_v47  ;;  %v3677_v58 = vpop.f32.mrb[29].mxu0 }
 0x6a6   : > { %v3091_v59 = vadd.f32 %v3090_v57, %v3087_v6 }
 0x6a8   : > { %3093 = vst.msk [vmem:[%s704_s27] sm:$0x1] %vm3092_vm14, %v3091_v59 }
 0x6a9   : > { %4069 = shalt.err (!%p4066_p3)
}
 0x6aa   : > { %s4070_s21 = scalar_lea.hbm %s5170_s1, 16  ;;  %s4074_s27 = scalar_lea.hbm %s5267_s22, 32 }
 0x6ab   : > { %p4071_p4 = scmp.ne.s32.totalorder %s5170_s1, %s4070_s21  ;;  %p4075_p9 = scmp.lt.u32.totalorder %s5170_s1, %s5267_s22 }
 0x6ac   : > { %p4076_p10 = scmp.lt.u32.totalorder %s4074_s27, %s4070_s21  ;;  %p4078_p12 = scmp.lt.u32.totalorder %s4070_s21, %s5170_s1 }
 0x6ad   : > { %p4072_p7 = pnand %p4071_p4, %p4274_p5 }
 0x6ae   : > { %p4077_p11 = por %p4076_p10, %p4075_p9 }
 0x6af   : > { %p4073_p8 = pneg %p4072_p7 }
 0x6b0   : > { %p4079_p13 = por %p4078_p12, %p4077_p11 }
 0x6b2   : > { %p4080_p0 = pnand %p4079_p13, %p4073_p8 }
 0x6b4   : > { %4083 = shalt.err (!%p4080_p0)
}
 0x6b5   : > { %4011 = dma.vmem_to_hbm [thread:$0]  (%p4274_p5), %s5172_s29, 16, %s5170_s1, %s3095_s0  }
 0x6b6 PF: > { %s5268_s28 = sld [smem:[#allocation7_spill]]  ;;  %s5269_s3 = sld [smem:[#allocation5_spill]] }
 0x6bc   : > { %p4017_p1 = scmp.ge.s32.totalorder %s5268_s28, 2  ;;  %s3119_s2 = sand.u32 1, %s5269_s3  }
 0x6bd   : > { %s3120_s6 = scalar_lea.sflag [#allocation3], %s3119_s2 }
 0x6be   : > { %p4014_p2 = pnand %p4017_p1, %p4278_p6 }
 0x6c0   : > { %4101 = dma.done.wait (!%p4014_p2), %s3120_s6, 16  }
 0x6c1   : > { %4103 = vsyncadd (!%p4014_p2), %s3120_s6, 4294967280  ;;  %s5271_s27 = sld [smem:[#allocation8_spill]]  ;;  %s5272_s21 = sld [smem:[#allocation6_spill]] }
 0x6c2   : > { %s5273_s26 = sld [smem:[#allocation9_spill]]  ;;  %s5274_s2 = smov %s4110_s25 }
 0x6c7   : > { %p31_p3 = scmp.ge.s32.totalorder %s5271_s27, 4   ;;  %s5275_s25 = smov %s5272_s21 }
 0x6c9   :  { %33 = sbr.rel (!%p31_p3) target bundleno = 12 (0xc), region = 151 }
 0x6d0   :  { %3124 = vsyncpa [#allocation3], 1 }
 0x6d1   :  { %3126 = vsyncpa [#allocation3 + $0x1], 1 }

</bundles_post_ra>
